<compile_context>
chip_gen: v5e
topology: v5e:2x2
jax: 0.10.0
libtpu: 0.0.40
codegen_flags: <defaults>
</compile_context>

<pallas_src>
import jax
import jax.numpy as jnp
from jax.experimental import pallas as pl
from jax.experimental.pallas import tpu as pltpu

EPS = 1e-6


# ---------------------------------------------------------------------------
# Fused kernel: aggregation -> featnet (pointwise) -> VQ, channels-first.
#   occ_ref : (1, S1, 1,  TN)   occ_memRs[:, 1:]       (voxels on lanes)
#   unp_ref : (1, S1, Cu, TN)   unp_memRs[:, 1:]
#   w_ref   : (D, 1+Cu)         featnet pointwise weights (channels-first)
#   b_ref   : (D, 1)            featnet bias
#   e_ref   : (K, D)            codebook
#   et_ref  : (D, K)            codebook transposed (precomputed, grid-invariant)
#   e2_ref  : (K, 1)            ||e_k||^2 (precomputed, grid-invariant)
# outputs (all lane-dense):
#   quant_ref : (1, D, TN)   quantized features
#   code_ref  : (1, 1, TN)   int32 codebook indices
#   valid_ref : (1, 1, TN)   aggregated validity mask
#   se_ref    : (1, 1, TN)   per-voxel squared error ||q - z||^2 (reduced in wrapper)
# ---------------------------------------------------------------------------
def fused_kernel(occ_ref, unp_ref, w_ref, b_ref, e_ref, et_ref, e2_ref,
                 quant_ref, code_ref, valid_ref, se_ref):
    occ = occ_ref[0]                                   # (S1, 1, TN)
    unp = unp_ref[0]                                   # (S1, Cu, TN)

    # --- sequence aggregation -------------------------------------------------
    # feat channels = [occ, unp*occ]; "any channel nonzero" == (occ != 0), and the
    # masked sums simplify to plain sums because unp*occ is already 0 where occ==0.
    valid_s = (occ != 0.0).astype(jnp.float32)         # (S1, 1, TN)
    vs = jnp.sum(valid_s, axis=0)                      # (1, TN)
    inv_den = 1.0 / (vs + EPS)                         # reduce_masked_mean denominator
    x0 = jnp.sum(occ, axis=0) * inv_den                # (1, TN)  occ channel
    xr = jnp.sum(unp * occ, axis=0) * inv_den          # (Cu, TN) rgb channels

    # --- featnet: pointwise conv 4->D as VPU broadcast MADs + ReLU + L2 norm ---
    w = w_ref[...]                                     # (D, 1+Cu)
    y = b_ref[...] + w[:, 0:1] * x0                    # (D, TN)
    cu = xr.shape[0]
    for c in range(cu):                                # unrolled: Cu is tiny (3)
        y = y + w[:, c + 1:c + 2] * xr[c:c + 1]
    y = jnp.maximum(y, 0.0)
    inv_norm = jax.lax.rsqrt(jnp.sum(y * y, axis=0, keepdims=True) + EPS)
    z = y * inv_norm                                   # (D, TN) normalized features

    # --- VQ: nearest codebook entry (||z||^2 dropped: constant per voxel) ------
    e = e_ref[...]                                     # (K, D)
    dots = jnp.dot(e, z, preferred_element_type=jnp.float32)      # (K, TN)
    metric = e2_ref[...] - 2.0 * dots                  # (K, TN)
    min_m = jnp.min(metric, axis=0, keepdims=True)     # (1, TN)
    K = metric.shape[0]
    iota = jax.lax.broadcasted_iota(jnp.int32, metric.shape, 0).astype(jnp.float32)
    codes_f = jnp.min(jnp.where(metric <= min_m, iota, jnp.float32(K)),
                      axis=0, keepdims=True)           # (1, TN) first-occurrence argmin
    onehot = (iota == codes_f).astype(jnp.float32)     # (K, TN)
    q = jnp.dot(et_ref[...], onehot,
                preferred_element_type=jnp.float32)    # (D, TN) quantized

    quant_ref[0] = q
    code_ref[0] = codes_f.astype(jnp.int32)
    # TODO(synk): original valid_memR comes out of FeatNet3D; aggregated validity used here.
    valid_ref[0] = jnp.minimum(vs, 1.0)
    diff = q - z
    se_ref[0] = jnp.sum(diff * diff, axis=0, keepdims=True)


# ---------------------------------------------------------------------------
# Wrapper reproducing the run_train() feat -> featnet -> vq path
# ---------------------------------------------------------------------------
def carla_vq3drgb_forward(occ_memRs, unp_memRs, feat_w, feat_b, codebook):
    B, S, _, Z, Y, X = occ_memRs.shape
    assert S >= 2
    S1 = S - 1
    Cu = unp_memRs.shape[2]
    C_in = 1 + Cu
    assert feat_w.shape[0] == C_in
    D = feat_w.shape[1]
    Kc = codebook.shape[0]
    N = Z * Y * X

    # channels-first flatten of the spatial dims (free reshape, no transpose, no concat)
    occ1 = occ_memRs[:, 1:].reshape(B, S1, 1, N).astype(jnp.float32)
    unp1 = unp_memRs[:, 1:].reshape(B, S1, Cu, N).astype(jnp.float32)

    # Voxel tile on the 128-lane axis.  Large tiles amortize per-grid-step overhead;
    # 2048 keeps double-buffered blocks comfortably inside v7x's smaller (64 MiB) VMEM.
    TN = max(128, min(2048, pl.next_power_of_2(N)))
    NT = pl.cdiv(N, TN)
    N_pad = NT * TN
    if N_pad != N:
        pad = [(0, 0), (0, 0), (0, 0), (0, N_pad - N)]
        occ1 = jnp.pad(occ1, pad)          # padded voxels: occ=0 -> sliced off below
        unp1 = jnp.pad(unp1, pad)

    # tiny grid-invariant parameter blocks, channels-first
    w_t = jnp.asarray(feat_w, jnp.float32).T            # (D, C_in)
    b_t = jnp.asarray(feat_b, jnp.float32).reshape(D, 1)  # (D, 1)
    e = jnp.asarray(codebook, jnp.float32)               # (K, D)
    e_t = e.T                                             # (D, K)
    e2 = jnp.sum(e * e, axis=1, keepdims=True)            # (K, 1)

    quant, codes, valid, se = pl.pallas_call(
        fused_kernel,
        out_shape=(jax.ShapeDtypeStruct((B, D, N_pad), jnp.float32),
                   jax.ShapeDtypeStruct((B, 1, N_pad), jnp.int32),
                   jax.ShapeDtypeStruct((B, 1, N_pad), jnp.float32),
                   jax.ShapeDtypeStruct((B, 1, N_pad), jnp.float32)),
        grid=(B, NT),
        in_specs=[
            pl.BlockSpec((1, S1, 1, TN), lambda b, i: (b, 0, 0, i)),
            pl.BlockSpec((1, S1, Cu, TN), lambda b, i: (b, 0, 0, i)),
            pl.BlockSpec((D, C_in), lambda b, i: (0, 0)),
            pl.BlockSpec((D, 1), lambda b, i: (0, 0)),
            pl.BlockSpec((Kc, D), lambda b, i: (0, 0)),
            pl.BlockSpec((D, Kc), lambda b, i: (0, 0)),
            pl.BlockSpec((Kc, 1), lambda b, i: (0, 0)),
        ],
        out_specs=(
            pl.BlockSpec((1, D, TN), lambda b, i: (b, 0, i)),
            pl.BlockSpec((1, 1, TN), lambda b, i: (b, 0, i)),
            pl.BlockSpec((1, 1, TN), lambda b, i: (b, 0, i)),
            pl.BlockSpec((1, 1, TN), lambda b, i: (b, 0, i)),
        ),
        compiler_params=pltpu.CompilerParams(
            dimension_semantics=("parallel", "parallel")),
    )(occ1, unp1, w_t, b_t, e, e_t, e2)

    # per-voxel squared errors -> mean MSE; padded voxels excluded by the :N slice
    # TODO(synk): original vq loss = commit*||z-sg(e)||^2 + ||sg(z)-e||^2; forward value here is mean MSE.
    vq_loss = jnp.sum(se[:, 0, :N]) / jnp.float32(B * N * D)
    feat_loss = jnp.float32(0.0)  # TODO(synk): FeatNet3D smoothness loss not modeled
    total_loss = feat_loss + vq_loss

    # already channels-first -> free reshapes back to NCDHW-style grids (no transposes)
    feat_memR_q = quant[:, :, :N].reshape(B, D, Z, Y, X)
    code_vox = codes[:, :, :N].reshape(B, 1, Z, Y, X)
    valid_memR = valid[:, :, :N].reshape(B, 1, Z, Y, X)
    return total_loss, feat_memR_q, code_vox, valid_memR


if __name__ == "__main__":
    key = jax.random.PRNGKey(0)
    B, S, Z, Y, X = 2, 3, 8, 8, 8
    C_in, D, K = 4, 32, 64
    k1, k2, k3, k4, k5 = jax.random.split(key, 5)

    # synthetic voxelized inputs (occ is binary, unp is unprojected RGB)
    occ_memRs = (jax.random.uniform(k1, (B, S, 1, Z, Y, X)) < 0.3).astype(jnp.float32)
    unp_memRs = jax.random.uniform(k2, (B, S, 3, Z, Y, X), minval=-0.5, maxval=0.5)

    # deterministic synthetic parameters
    feat_w = jax.random.normal(k3, (C_in, D), jnp.float32) * 0.1
    feat_b = jax.random.normal(k4, (1, D), jnp.float32) * 0.01
    codebook = jax.random.normal(k5, (K, D), jnp.float32) * 0.1

    fwd = jax.jit(carla_vq3drgb_forward)
    total_loss, feat_q, code_vox, valid_memR = fwd(
        occ_memRs, unp_memRs, feat_w, feat_b, codebook)
    jax.block_until_ready((total_loss, feat_q, code_vox, valid_memR))
    print("KERNEL_OK")
</pallas_src>

<mosaic_0001>
module attributes {stable_mosaic.version = 11 : i64} {
  func.func @fused_kernel(%arg0: i32, %arg1: i32, %arg2: memref<1x2x1x512xf32, #tpu.memory_space<vmem>>, %arg3: memref<1x2x3x512xf32, #tpu.memory_space<vmem>>, %arg4: memref<32x4xf32, #tpu.memory_space<vmem>>, %arg5: memref<32x1xf32, #tpu.memory_space<vmem>>, %arg6: memref<64x32xf32, #tpu.memory_space<vmem>>, %arg7: memref<32x64xf32, #tpu.memory_space<vmem>>, %arg8: memref<64x1xf32, #tpu.memory_space<vmem>>, %arg9: memref<1x32x512xf32, #tpu.memory_space<vmem>>, %arg10: memref<1x1x512xi32, #tpu.memory_space<vmem>>, %arg11: memref<1x1x512xf32, #tpu.memory_space<vmem>>, %arg12: memref<1x1x512xf32, #tpu.memory_space<vmem>>) attributes {dimension_semantics = [#tpu.dimension_semantics<parallel>, #tpu.dimension_semantics<parallel>], iteration_bounds = array<i64: 2, 1>, scalar_prefetch = 0 : i64, scratch_operands = 0 : i64, tpu.core_type = #tpu.core_type<tc>, window_params = [{transform_indices = @transform_0, window_bounds = array<i64: 1, 2, 1, 512>}, {transform_indices = @transform_1, window_bounds = array<i64: 1, 2, 3, 512>}, {pipeline_mode = #tpu.pipeline_mode<synchronous>, transform_indices = @transform_2, window_bounds = array<i64: 32, 4>}, {pipeline_mode = #tpu.pipeline_mode<synchronous>, transform_indices = @transform_3, window_bounds = array<i64: 32, 1>}, {pipeline_mode = #tpu.pipeline_mode<synchronous>, transform_indices = @transform_4, window_bounds = array<i64: 64, 32>}, {pipeline_mode = #tpu.pipeline_mode<synchronous>, transform_indices = @transform_5, window_bounds = array<i64: 32, 64>}, {pipeline_mode = #tpu.pipeline_mode<synchronous>, transform_indices = @transform_6, window_bounds = array<i64: 64, 1>}, {transform_indices = @transform_7, window_bounds = array<i64: 1, 32, 512>}, {transform_indices = @transform_8, window_bounds = array<i64: 1, 1, 512>}, {transform_indices = @transform_9, window_bounds = array<i64: 1, 1, 512>}, {transform_indices = @transform_10, window_bounds = array<i64: 1, 1, 512>}]} {
    %c0 = arith.constant 0 : index
    %c0_0 = arith.constant 0 : index
    %c0_1 = arith.constant 0 : index
    %c0_2 = arith.constant 0 : index
    %0 = vector.load %arg2[%c0, %c0_0, %c0_1, %c0_2] : memref<1x2x1x512xf32, #tpu.memory_space<vmem>>, vector<1x2x1x512xf32>
    %1 = vector.shape_cast %0 : vector<1x2x1x512xf32> to vector<2x1x512xf32>
    %c0_3 = arith.constant 0 : index
    %c0_4 = arith.constant 0 : index
    %c0_5 = arith.constant 0 : index
    %c0_6 = arith.constant 0 : index
    %2 = vector.load %arg3[%c0_3, %c0_4, %c0_5, %c0_6] : memref<1x2x3x512xf32, #tpu.memory_space<vmem>>, vector<1x2x3x512xf32>
    %3 = vector.shape_cast %2 : vector<1x2x3x512xf32> to vector<2x3x512xf32>
    %cst = arith.constant 0.000000e+00 : f32
    %4 = vector.broadcast %cst : f32 to vector<2x1x512xf32>
    %5 = arith.cmpf one, %1, %4 : vector<2x1x512xf32>
    %6 = arith.extui %5 : vector<2x1x512xi1> to vector<2x1x512xi32>
    %7 = arith.sitofp %6 : vector<2x1x512xi32> to vector<2x1x512xf32>
    %cst_7 = arith.constant dense<0.000000e+00> : vector<1x512xf32>
    %8 = vector.multi_reduction <add>, %7, %cst_7 [0] : vector<2x1x512xf32> to vector<1x512xf32>
    %cst_8 = arith.constant 9.99999997E-7 : f32
    %9 = vector.broadcast %cst_8 : f32 to vector<1x512xf32>
    %10 = arith.addf %8, %9 : vector<1x512xf32>
    %cst_9 = arith.constant 1.000000e+00 : f32
    %11 = vector.broadcast %cst_9 : f32 to vector<1x512xf32>
    %12 = arith.divf %11, %10 : vector<1x512xf32>
    %cst_10 = arith.constant dense<0.000000e+00> : vector<1x512xf32>
    %13 = vector.multi_reduction <add>, %1, %cst_10 [0] : vector<2x1x512xf32> to vector<1x512xf32>
    %14 = arith.mulf %13, %12 : vector<1x512xf32>
    %15 = vector.broadcast %1 : vector<2x1x512xf32> to vector<2x3x512xf32>
    %16 = arith.mulf %3, %15 : vector<2x3x512xf32>
    %cst_11 = arith.constant dense<0.000000e+00> : vector<3x512xf32>
    %17 = vector.multi_reduction <add>, %16, %cst_11 [0] : vector<2x3x512xf32> to vector<3x512xf32>
    %18 = vector.broadcast %12 : vector<1x512xf32> to vector<3x512xf32>
    %19 = arith.mulf %17, %18 : vector<3x512xf32>
    %c0_12 = arith.constant 0 : index
    %c0_13 = arith.constant 0 : index
    %20 = vector.load %arg4[%c0_12, %c0_13] : memref<32x4xf32, #tpu.memory_space<vmem>>, vector<32x4xf32>
    %c0_14 = arith.constant 0 : index
    %c0_15 = arith.constant 0 : index
    %21 = vector.load %arg5[%c0_14, %c0_15] : memref<32x1xf32, #tpu.memory_space<vmem>>, vector<32x1xf32>
    %22 = vector.extract_strided_slice %20 {offsets = [0, 0], sizes = [32, 1], strides = [1, 1]} : vector<32x4xf32> to vector<32x1xf32>
    %23 = vector.broadcast %22 : vector<32x1xf32> to vector<32x512xf32>
    %24 = vector.broadcast %14 : vector<1x512xf32> to vector<32x512xf32>
    %25 = arith.mulf %23, %24 : vector<32x512xf32>
    %26 = vector.broadcast %21 : vector<32x1xf32> to vector<32x512xf32>
    %27 = arith.addf %26, %25 : vector<32x512xf32>
    %28 = vector.extract_strided_slice %20 {offsets = [0, 1], sizes = [32, 1], strides = [1, 1]} : vector<32x4xf32> to vector<32x1xf32>
    %29 = vector.extract_strided_slice %19 {offsets = [0, 0], sizes = [1, 512], strides = [1, 1]} : vector<3x512xf32> to vector<1x512xf32>
    %30 = vector.broadcast %28 : vector<32x1xf32> to vector<32x512xf32>
    %31 = vector.broadcast %29 : vector<1x512xf32> to vector<32x512xf32>
    %32 = arith.mulf %30, %31 : vector<32x512xf32>
    %33 = arith.addf %27, %32 : vector<32x512xf32>
    %34 = vector.extract_strided_slice %20 {offsets = [0, 2], sizes = [32, 1], strides = [1, 1]} : vector<32x4xf32> to vector<32x1xf32>
    %35 = vector.extract_strided_slice %19 {offsets = [1, 0], sizes = [1, 512], strides = [1, 1]} : vector<3x512xf32> to vector<1x512xf32>
    %36 = vector.broadcast %34 : vector<32x1xf32> to vector<32x512xf32>
    %37 = vector.broadcast %35 : vector<1x512xf32> to vector<32x512xf32>
    %38 = arith.mulf %36, %37 : vector<32x512xf32>
    %39 = arith.addf %33, %38 : vector<32x512xf32>
    %40 = vector.extract_strided_slice %20 {offsets = [0, 3], sizes = [32, 1], strides = [1, 1]} : vector<32x4xf32> to vector<32x1xf32>
    %41 = vector.extract_strided_slice %19 {offsets = [2, 0], sizes = [1, 512], strides = [1, 1]} : vector<3x512xf32> to vector<1x512xf32>
    %42 = vector.broadcast %40 : vector<32x1xf32> to vector<32x512xf32>
    %43 = vector.broadcast %41 : vector<1x512xf32> to vector<32x512xf32>
    %44 = arith.mulf %42, %43 : vector<32x512xf32>
    %45 = arith.addf %39, %44 : vector<32x512xf32>
    %cst_16 = arith.constant 0.000000e+00 : f32
    %46 = vector.broadcast %cst_16 : f32 to vector<32x512xf32>
    %47 = arith.maximumf %45, %46 : vector<32x512xf32>
    %48 = arith.mulf %47, %47 : vector<32x512xf32>
    %cst_17 = arith.constant dense<0.000000e+00> : vector<512xf32>
    %49 = vector.multi_reduction <add>, %48, %cst_17 [0] : vector<32x512xf32> to vector<512xf32>
    %50 = vector.shape_cast %49 : vector<512xf32> to vector<1x512xf32>
    %cst_18 = arith.constant 9.99999997E-7 : f32
    %51 = vector.broadcast %cst_18 : f32 to vector<1x512xf32>
    %52 = arith.addf %50, %51 : vector<1x512xf32>
    %53 = math.rsqrt %52 : vector<1x512xf32>
    %54 = vector.broadcast %53 : vector<1x512xf32> to vector<32x512xf32>
    %55 = arith.mulf %47, %54 : vector<32x512xf32>
    %c0_19 = arith.constant 0 : index
    %c0_20 = arith.constant 0 : index
    %56 = vector.load %arg6[%c0_19, %c0_20] : memref<64x32xf32, #tpu.memory_space<vmem>>, vector<64x32xf32>
    %cst_21 = arith.constant dense<0.000000e+00> : vector<64x512xf32>
    %57 = tpu.matmul %56, %55, %cst_21 {dimension_numbers = #tpu.dot_dimension_numbers<[1], [0], [0], [1], [0, 0, 1, 1], [], []>} : vector<64x32xf32>, vector<32x512xf32>, vector<64x512xf32> -> vector<64x512xf32>
    %c0_22 = arith.constant 0 : index
    %c0_23 = arith.constant 0 : index
    %58 = vector.load %arg8[%c0_22, %c0_23] : memref<64x1xf32, #tpu.memory_space<vmem>>, vector<64x1xf32>
    %cst_24 = arith.constant 2.000000e+00 : f32
    %59 = vector.broadcast %cst_24 : f32 to vector<64x512xf32>
    %60 = arith.mulf %59, %57 : vector<64x512xf32>
    %61 = vector.broadcast %58 : vector<64x1xf32> to vector<64x512xf32>
    %62 = arith.subf %61, %60 : vector<64x512xf32>
    %cst_25 = arith.constant dense<0x7F800000> : vector<512xf32>
    %63 = vector.multi_reduction <minimumf>, %62, %cst_25 [0] : vector<64x512xf32> to vector<512xf32>
    %64 = vector.shape_cast %63 : vector<512xf32> to vector<1x512xf32>
    %65 = tpu.iota {dimensions = array<i32: 0>} : vector<64x512xi32>
    %66 = arith.sitofp %65 : vector<64x512xi32> to vector<64x512xf32>
    %67 = vector.broadcast %64 : vector<1x512xf32> to vector<64x512xf32>
    %68 = arith.cmpf ole, %62, %67 : vector<64x512xf32>
    %cst_26 = arith.constant 6.400000e+01 : f32
    %69 = vector.broadcast %cst_26 : f32 to vector<64x512xf32>
    %70 = arith.select %68, %66, %69 : vector<64x512xi1>, vector<64x512xf32>
    %cst_27 = arith.constant dense<0x7F800000> : vector<512xf32>
    %71 = vector.multi_reduction <minimumf>, %70, %cst_27 [0] : vector<64x512xf32> to vector<512xf32>
    %72 = vector.shape_cast %71 : vector<512xf32> to vector<1x512xf32>
    %73 = vector.broadcast %72 : vector<1x512xf32> to vector<64x512xf32>
    %74 = arith.cmpf oeq, %66, %73 : vector<64x512xf32>
    %75 = arith.extui %74 : vector<64x512xi1> to vector<64x512xi32>
    %76 = arith.sitofp %75 : vector<64x512xi32> to vector<64x512xf32>
    %c0_28 = arith.constant 0 : index
    %c0_29 = arith.constant 0 : index
    %77 = vector.load %arg7[%c0_28, %c0_29] : memref<32x64xf32, #tpu.memory_space<vmem>>, vector<32x64xf32>
    %cst_30 = arith.constant dense<0.000000e+00> : vector<32x512xf32>
    %78 = tpu.matmul %77, %76, %cst_30 {dimension_numbers = #tpu.dot_dimension_numbers<[1], [0], [0], [1], [0, 0, 1, 1], [], []>} : vector<32x64xf32>, vector<64x512xf32>, vector<32x512xf32> -> vector<32x512xf32>
    %c0_31 = arith.constant 0 : index
    %c0_32 = arith.constant 0 : index
    %c0_33 = arith.constant 0 : index
    %79 = vector.load %arg9[%c0_31, %c0_32, %c0_33] : memref<1x32x512xf32, #tpu.memory_space<vmem>>, vector<1x32x512xf32>
    %80 = vector.shape_cast %79 : vector<1x32x512xf32> to vector<32x512xf32>
    %81 = vector.shape_cast %78 : vector<32x512xf32> to vector<1x32x512xf32>
    tpu.vector_store %arg9[%c0_31, %c0_32, %c0_33], %81 {strides = array<i32>} : memref<1x32x512xf32, #tpu.memory_space<vmem>>, vector<1x32x512xf32>,
    %82 = arith.fptosi %72 : vector<1x512xf32> to vector<1x512xi32>
    %c0_34 = arith.constant 0 : index
    %c0_35 = arith.constant 0 : index
    %c0_36 = arith.constant 0 : index
    %83 = vector.load %arg10[%c0_34, %c0_35, %c0_36] : memref<1x1x512xi32, #tpu.memory_space<vmem>>, vector<1x1x512xi32>
    %84 = vector.shape_cast %83 : vector<1x1x512xi32> to vector<1x512xi32>
    %85 = vector.shape_cast %82 : vector<1x512xi32> to vector<1x1x512xi32>
    tpu.vector_store %arg10[%c0_34, %c0_35, %c0_36], %85 {strides = array<i32>} : memref<1x1x512xi32, #tpu.memory_space<vmem>>, vector<1x1x512xi32>,
    %cst_37 = arith.constant 1.000000e+00 : f32
    %86 = vector.broadcast %cst_37 : f32 to vector<1x512xf32>
    %87 = arith.minimumf %8, %86 : vector<1x512xf32>
    %c0_38 = arith.constant 0 : index
    %c0_39 = arith.constant 0 : index
    %c0_40 = arith.constant 0 : index
    %88 = vector.load %arg11[%c0_38, %c0_39, %c0_40] : memref<1x1x512xf32, #tpu.memory_space<vmem>>, vector<1x1x512xf32>
    %89 = vector.shape_cast %88 : vector<1x1x512xf32> to vector<1x512xf32>
    %90 = vector.shape_cast %87 : vector<1x512xf32> to vector<1x1x512xf32>
    tpu.vector_store %arg11[%c0_38, %c0_39, %c0_40], %90 {strides = array<i32>} : memref<1x1x512xf32, #tpu.memory_space<vmem>>, vector<1x1x512xf32>,
    %91 = arith.subf %78, %55 : vector<32x512xf32>
    %92 = arith.mulf %91, %91 : vector<32x512xf32>
    %cst_41 = arith.constant dense<0.000000e+00> : vector<512xf32>
    %93 = vector.multi_reduction <add>, %92, %cst_41 [0] : vector<32x512xf32> to vector<512xf32>
    %94 = vector.shape_cast %93 : vector<512xf32> to vector<1x512xf32>
    %c0_42 = arith.constant 0 : index
    %c0_43 = arith.constant 0 : index
    %c0_44 = arith.constant 0 : index
    %95 = vector.load %arg12[%c0_42, %c0_43, %c0_44] : memref<1x1x512xf32, #tpu.memory_space<vmem>>, vector<1x1x512xf32>
    %96 = vector.shape_cast %95 : vector<1x1x512xf32> to vector<1x512xf32>
    %97 = vector.shape_cast %94 : vector<1x512xf32> to vector<1x1x512xf32>
    tpu.vector_store %arg12[%c0_42, %c0_43, %c0_44], %97 {strides = array<i32>} : memref<1x1x512xf32, #tpu.memory_space<vmem>>, vector<1x1x512xf32>,
    return
  }
  func.func @transform_0(%arg0: i32, %arg1: i32) -> (i32, i32, i32, i32) {
    %c0_i32 = arith.constant 0 : i32
    %c0_i32_0 = arith.constant 0 : i32
    %c0_i32_1 = arith.constant 0 : i32
    return %arg0, %c0_i32, %c0_i32_0, %arg1 : i32, i32, i32, i32
  }
  func.func @transform_1(%arg0: i32, %arg1: i32) -> (i32, i32, i32, i32) {
    %c0_i32 = arith.constant 0 : i32
    %c0_i32_0 = arith.constant 0 : i32
    %c0_i32_1 = arith.constant 0 : i32
    return %arg0, %c0_i32, %c0_i32_0, %arg1 : i32, i32, i32, i32
  }
  func.func @transform_2(%arg0: i32, %arg1: i32) -> (i32, i32) {
    %c0_i32 = arith.constant 0 : i32
    %c0_i32_0 = arith.constant 0 : i32
    %c0_i32_1 = arith.constant 0 : i32
    return %c0_i32, %c0_i32_0 : i32, i32
  }
  func.func @transform_3(%arg0: i32, %arg1: i32) -> (i32, i32) {
    %c0_i32 = arith.constant 0 : i32
    %c0_i32_0 = arith.constant 0 : i32
    %c0_i32_1 = arith.constant 0 : i32
    return %c0_i32, %c0_i32_0 : i32, i32
  }
  func.func @transform_4(%arg0: i32, %arg1: i32) -> (i32, i32) {
    %c0_i32 = arith.constant 0 : i32
    %c0_i32_0 = arith.constant 0 : i32
    %c0_i32_1 = arith.constant 0 : i32
    return %c0_i32, %c0_i32_0 : i32, i32
  }
  func.func @transform_5(%arg0: i32, %arg1: i32) -> (i32, i32) {
    %c0_i32 = arith.constant 0 : i32
    %c0_i32_0 = arith.constant 0 : i32
    %c0_i32_1 = arith.constant 0 : i32
    return %c0_i32, %c0_i32_0 : i32, i32
  }
  func.func @transform_6(%arg0: i32, %arg1: i32) -> (i32, i32) {
    %c0_i32 = arith.constant 0 : i32
    %c0_i32_0 = arith.constant 0 : i32
    %c0_i32_1 = arith.constant 0 : i32
    return %c0_i32, %c0_i32_0 : i32, i32
  }
  func.func @transform_7(%arg0: i32, %arg1: i32) -> (i32, i32, i32) {
    %c0_i32 = arith.constant 0 : i32
    %c0_i32_0 = arith.constant 0 : i32
    return %arg0, %c0_i32, %arg1 : i32, i32, i32
  }
  func.func @transform_8(%arg0: i32, %arg1: i32) -> (i32, i32, i32) {
    %c0_i32 = arith.constant 0 : i32
    %c0_i32_0 = arith.constant 0 : i32
    return %arg0, %c0_i32, %arg1 : i32, i32, i32
  }
  func.func @transform_9(%arg0: i32, %arg1: i32) -> (i32, i32, i32) {
    %c0_i32 = arith.constant 0 : i32
    %c0_i32_0 = arith.constant 0 : i32
    return %arg0, %c0_i32, %arg1 : i32, i32, i32
  }
  func.func @transform_10(%arg0: i32, %arg1: i32) -> (i32, i32, i32) {
    %c0_i32 = arith.constant 0 : i32
    %c0_i32_0 = arith.constant 0 : i32
    return %arg0, %c0_i32, %arg1 : i32, i32, i32
  }
}

</mosaic_0001>

<bundles_post_ra>
// kernel: carla_vq3drgb_forward.1
= control target key start
LH: loop header
LB: loop body
LE: loop exit
PB: predicated region body
PF: predicated region fallthrough
CT: control target
= control target key end

     0   :  { %s2456_s13 = smov 0   ;;  %s2458_s14 = smov 0   ;;  %s3467_s0 = inlined_call_operand.vmem [shape: f32[2,2,1,512], index: 0, kind: input, shape index: {}]   ;;  %s3468_s1 = inlined_call_operand.vmem [shape: f32[2,2,3,512], index: 1, kind: input, shape index: {}]   ;;  %s3469_s2 = inlined_call_operand.vmem [shape: f32[32,4], index: 2, kind: input, shape index: {}]   ;;  %s3470_s3 = inlined_call_operand.vmem [shape: f32[32,1], index: 3, kind: input, shape index: {}]   ;;  %s3471_s4 = inlined_call_operand.vmem [shape: f32[64,32], index: 4, kind: input, shape index: {}]   ;;  %s3472_s5 = inlined_call_operand.vmem [shape: f32[32,64], index: 5, kind: input, shape index: {}]   ;;  %s3473_s6 = inlined_call_operand.vmem [shape: f32[64,1], index: 6, kind: input, shape index: {}]   ;;  %s3474_s7 = inlined_call_operand.vmem [shape: f32[2,32,512], index: 7, kind: output, shape index: {0}]   ;;  %s3475_s8 = inlined_call_operand.vmem [shape: s32[2,1,512], index: 8, kind: output, shape index: {1}]   ;;  %s3476_s9 = inlined_call_operand.vmem [shape: f32[2,1,512], index: 9, kind: output, shape index: {2}]   ;;  %s3477_s10 = inlined_call_operand.vmem [shape: f32[2,1,512], index: 10, kind: output, shape index: {3}]  }
   0x1   :  { %s2460_s15 = smov 0  }
   0x2 LB: > { %s33_s16 = sadd.s32 1, %s2389_s14  ;;  %p2160_p0 = scmp.ge.s32.totalorder %s2393_s15, 1  ;;  %s2393_s15 = sphi %s2460_s15, %s21_s15   ;;  %s2389_s14 = sphi %s2458_s14, %s3535_s14   ;;  %s2385_s13 = sphi %s2456_s13, %s3534_s13  }
   0x3   : > { %p35_p1 = scmp.ge.s32.totalorder %s33_s16, 2  ;;  %p362_p2 = scmp.lt.s32.totalorder %s2393_s15, 3 }
   0x5   : > { %s3537_s16 = smov (%p35_p1, %s33_s16), 0  ;;  %p363_p3 = pnand %p2160_p0, %p362_p2 }
   0x7   : > { %366 = sbr.rel (%p363_p3) target bundleno = 685 (0x2ad), region = 48 }
   0xc   : > { %v707_v0 = vld [vmem:[%s3470_s3 + $0x8] sm:$0xff]  ;;  %v704_v1 = vld [vmem:[%s3469_s2 + $0x10] sm:$0xff]  ;;  %v702_v2 = vld [vmem:[%s3469_s2] sm:$0xff]  ;;  %v2395_v3 = vmov 0   ;;  %v2396_v6 = vmov 1   ;;  %v2397_v9 = vmov 2  }
   0xd   : > { %2339 = vset.pattern.permute.xlu2 %v2395_v3  ;;  %2338 = vset.pattern.permute.xlu1 %v2395_v3  ;;  %v706_v4 = vld [vmem:[%s3470_s3] sm:$0xff]  ;;  %v703_v5 = vld [vmem:[%s3469_s2 + $0x8] sm:$0xff]  ;;  %v705_v7 = vld [vmem:[%s3469_s2 + $0x18] sm:$0xff]  ;;  %v2398_v11 = vmov 3   ;;  %p441_p4 = scmp.lt.s32.totalorder %s2385_s13, 1  ;;  %v2399_v14 = vmov 0.0  }
   0xe   : > { %2337 = vset.pattern.permute.xlu0 %v2395_v3  ;;  %757 = vperm.xlu2 %2339, %v707_v0   ;;  %v708_v8 = vld [vmem:[%s3470_s3 + $0x10] sm:$0xff]  ;;  %v709_v10 = vld [vmem:[%s3470_s3 + $0x18] sm:$0xff]  ;;  %vm526_vm2 = vcmask 1040384   ;;  %vm641_vm3 = vcmask 1043456   ;;  %vm681_vm15 = vcmask 1042432  }
   0xf   : > { %722 = vperm.xlu1 %2338, %v704_v1   ;;  %712 = vperm.xlu0 %2337, %v702_v2   ;;  %s3539_s13 = smov (!%p441_p4, %s2385_s13), 1 }
  0x10   : > { %s2161_s17 = sshll.u32 %s3539_s13, 3  ;;  %s2285_s21 = sshll.u32 %s3539_s13, 5 }
  0x11   : > { %s447_s20 = scalar_lea.vmem %s3467_s0, %s2161_s17  ;;  %s457_s24 = scalar_lea.vmem %s3468_s1, %s2285_s21 }
  0x12   : > { %v496_v12 = vld [vmem:[%s447_s20] sm:$0xf]  ;;  %v2508_v13 = vld [vmem:[%s447_s20 + $0x4] sm:$0xf]  ;;  %v499_v36 = vld [vmem:[%s457_s24 + $0x8] sm:$0x77] }
  0x13   : > { %vm502_vm0 = vcmp.ne.f32.partialorder %v496_v12, 0.0  ;;  %vm503_vm1 = vcmp.ne.f32.partialorder %v2508_v13, 0.0  ;;  %v606_v19 = vperm.slane %v496_v12, 1  ;;  %v608_v23 = vperm.slane %v496_v12, 3  ;;  %v498_v31 = vld [vmem:[%s457_s24] sm:$0x77] }
  0x14   : > { %v2511_v15 = vsel %vm502_vm0, 1.0, %v2399_v14  ;;  %v2514_v16 = vsel %vm503_vm1, 1.0, %v2399_v14  ;;  %v605_v25 = vperm.slane %v496_v12, 0  ;;  %v610_v26 = vperm.slane %v2508_v13, 1  ;;  %v500_v37 = vld [vmem:[%s457_s24 + $0x10] sm:$0x77] }
  0x15   : > { %v510_v17 = vperm.slane %v2511_v15, 0  ;;  %v511_v18 = vperm.slane %v2511_v15, 1  ;;  %v512_v20 = vperm.slane %v2511_v15, 2  ;;  %v513_v21 = vperm.slane %v2511_v15, 3  ;;  %v501_v40 = vld [vmem:[%s457_s24 + $0x18] sm:$0x77] }
  0x16   : > { %2340 = vset.pattern.permute.xlu2 %v2396_v6  ;;  %v514_v22 = vperm.slane %v2514_v16, 0  ;;  %v515_v24 = vperm.slane %v2514_v16, 1  ;;  %v607_v27 = vperm.slane %v496_v12, 2  ;;  %v609_v28 = vperm.slane %v2508_v13, 0  ;;  %s3348_s29 = sshll.u32 %s3539_s13, 2  ;;  %s2286_s21 = sshll.u32 %s3539_s13, 7 }
  0x17   : > { %752 = vperm.xlu1 %2338, %v706_v4   ;;  %717 = vperm.xlu0 %2337, %v703_v5   ;;  %v611_v29 = vperm.slane %v2508_v13, 2  ;;  %v612_v30 = vperm.slane %v2508_v13, 3  ;;  %v516_v32 = vperm.slane %v2514_v16, 2  ;;  %v517_v33 = vperm.slane %v2514_v16, 3  ;;  %s476_s18 = scalar_lea.vmem %s3475_s8, %s3348_s29  ;;  %s3402_s24 = scalar_lea.vmem %s3474_s7, %s2286_s21 }
  0x18   : > { %787 = vperm.xlu2 %2340, %v702_v2   ;;  %v637_v34 = vrot.slane %v606_v19, 4  ;;  %v638_v35 = vrot.slane %v608_v23, 4  ;;  %v639_v38 = vrot.slane %v610_v26, 4  ;;  %v527_v41 = vsel %vm526_vm2, %v510_v17, 0.0  ;;  %s485_s26 = scalar_lea.vmem %s3476_s9, %s3348_s29  ;;  %s494_s30 = scalar_lea.vmem %s3477_s10, %s3348_s29 }
  0x19   : > { %v640_v39 = vrot.slane %v612_v30, 4  ;;  %v528_v42 = vsel %vm526_vm2, %v514_v22, 0.0  ;;  %v530_v43 = vsel %vm526_vm2, %v511_v18, 0.0  ;;  %v531_v48 = vsel %vm526_vm2, %v515_v24, 0.0 }
  0x1a   : > { %v642_v44 = vsel %vm641_vm3, %v605_v25, %v637_v34  ;;  %v643_v45 = vsel %vm641_vm3, %v607_v27, %v638_v35  ;;  %v644_v46 = vsel %vm641_vm3, %v609_v28, %v639_v38  ;;  %v533_v52 = vsel %vm526_vm2, %v512_v20, 0.0 }
  0x1b   : > { %v645_v47 = vsel %vm641_vm3, %v611_v29, %v640_v39  ;;  %v650_v49 = vmul.f32 %v642_v44, %v498_v31  ;;  %v651_v50 = vmul.f32 %v643_v45, %v499_v36  ;;  %v652_v51 = vmul.f32 %v644_v46, %v500_v37 }
  0x1c   : > { %v534_v53 = vsel %vm526_vm2, %v516_v32, 0.0  ;;  %v653_v54 = vmul.f32 %v645_v47, %v501_v40  ;;  %v621_v55 = vsel %vm526_vm2, %v605_v25, 0.0  ;;  %v622_v56 = vsel %vm526_vm2, %v609_v28, 0.0 }
  0x1d   : > { %658 = vst [vmem:[#allocation1] ss:$2 sm:$0xff] %v650_v49  ;;  %v624_v57 = vsel %vm526_vm2, %v606_v19, 0.0  ;;  %v625_v58 = vsel %vm526_vm2, %v610_v26, 0.0  ;;  %v627_v59 = vsel %vm526_vm2, %v607_v27, 0.0  ;;  %v2542_v60 = vadd.f32 %v622_v56, %v621_v55 }
  0x1e   : > { %660 = vst [vmem:[#allocation1 + $0x10] ss:$2 sm:$0xff] %v651_v50  ;;  %v2544_v61 = vadd.f32 %v625_v58, %v624_v57  ;;  %v628_v62 = vsel %vm526_vm2, %v611_v29, 0.0  ;;  %v630_v63 = vsel %vm526_vm2, %v608_v23, 0.0  ;;  %v2548_v0 = vadd.f32 %v528_v42, %v527_v41 }
  0x1f   : > { %727 = vperm.xlu1 %2338, %v705_v7   ;;  %2341 = vset.pattern.permute.xlu0 %v2396_v6  ;;  %666 = vst [vmem:[#allocation1 + $0x20] ss:$2 sm:$0xff] %v652_v51 }
  0x20   : > { %2342 = vset.pattern.permute.xlu2 %v2395_v3  ;;  %791 = vperm.xlu0 %2341, %v703_v5   ;;  %668 = vst [vmem:[#allocation1 + $0x30] ss:$2 sm:$0xff] %v653_v54 }
  0x21   : > { %762 = vperm.xlu2 %2342, %v708_v8   ;;  %v539_v8 = vadd.f32 1e-06, %v2548_v0 }
  0x23   : > { %2355 = vrcp.f32 %v539_v8  ;;  %v552_v26 = vand.u32 2147483647, %v539_v8  ;;  %vm548_vm4 = vweird.f32 %v539_v8  ;;  %v554_v27 = vand.u32 2147483648, %v539_v8 }
  0x24   : > { %v661_v54 = vld.sshfl [vmem:[#allocation1] sm:$0xff pattern:$0x75316420]  ;;  %v662_v55 = vld.sshfl [vmem:[#allocation1 + $0x8] sm:$0xff pattern:$0x75316420] }
  0x25   : > { %vm2593_vm7 = vcmp.eq.f32.partialorder %v552_v26, 8.507059e+37  ;;  %v555_v40 = vor.u32 1.1754944e-38, %v554_v27  ;;  %v663_v56 = vld.sshfl [vmem:[#allocation1 + $0x10] sm:$0xff pattern:$0x75316420] }
  0x26   : > { %v669_v57 = vld.sshfl [vmem:[#allocation1 + $0x20] sm:$0xff pattern:$0x75316420] }
  0x27   : > { %2343 = vset.pattern.permute.xlu1 %v2396_v6 }
  0x28   : > { %795 = vperm.xlu1 %2343, %v704_v1   ;;  %2345 = vset.pattern.permute.xlu0 %v2397_v9 }
  0x29   : > { %2344 = vset.pattern.permute.xlu2 %v2397_v9  ;;  %843 = vperm.xlu0 %2345, %v703_v5   ;;  %v2572_v14 = vpop.eup %2355 }
  0x2a   : > { %839 = vperm.xlu2 %2344, %v702_v2   ;;  %v544_v19 = vmul.f32 %v2572_v14, %v539_v8  ;;  %vm549_vm6 = vweird.f32 %v2572_v14 }
  0x2b   : > { %vm2607_vm12 = vmor %vm548_vm4, %vm549_vm6 }
  0x2c   : > { %v545_v23 = vsub.f32 1.0, %v544_v19  ;;  %v672_v19 = vld.sshfl [vmem:[#allocation1 + $0x38] sm:$0xff pattern:$0x75316420] }
  0x2e   : > { %v546_v34 = vmul.f32 %v2572_v14, %v545_v23 }
  0x30   : > { %2346 = vset.pattern.permute.xlu1 %v2395_v3  ;;  %v547_v49 = vadd.f32 %v2572_v14, %v546_v34 }
  0x31   : > { %767 = vperm.xlu1 %2346, %v709_v10   ;;  %2350 = vset.pattern.permute.xlu0 %v2398_v11 }
  0x32   : > { %2347 = vset.pattern.permute.xlu2 %v2396_v6  ;;  %895 = vperm.xlu0 %2350, %v703_v5   ;;  %v2557_v5 = vadd.f32 %v534_v53, %v533_v52  ;;  %v536_v6 = vsel %vm526_vm2, %v513_v21, 0.0 }
  0x33   : > { %799 = vperm.xlu2 %2347, %v705_v7  }
  0x39   : > { %2348 = vset.pattern.permute.xlu1 %v2397_v9 }
  0x3a   : > { %847 = vperm.xlu1 %2348, %v704_v1   ;;  %2353 = vset.pattern.permute.xlu0 %v2395_v3 }
  0x3b   : > { %2349 = vset.pattern.permute.xlu2 %v2398_v11 }
  0x3c   : > { %891 = vperm.xlu2 %2349, %v702_v2   ;;  %v631_v2 = vsel %vm526_vm2, %v612_v30, 0.0 }
  0x3d   : > { %v2555_v4 = vadd.f32 %v631_v2, %v630_v63  ;;  %v551_v2 = vsel %vm2607_vm12, %v2572_v14, %v547_v49  ;;  %v682_v14 = vsel %vm681_vm15, %v661_v54, 0.0 }
  0x3e   : > { %v556_v23 = vsel %vm2593_vm7, %v555_v40, %v551_v2 }
  0x42   : > { %851 = vperm.xlu1 %2348, %v705_v7  }
  0x44   : > { %899 = vperm.xlu2 %2349, %v704_v1   ;;  %v2550_v1 = vadd.f32 %v628_v62, %v627_v59  ;;  %v670_v59 = vld.sshfl [vmem:[#allocation1 + $0x28] sm:$0xff pattern:$0x75316420]  ;;  %v671_v62 = vld.sshfl [vmem:[#allocation1 + $0x30] sm:$0xff pattern:$0x75316420] }
  0x4a   : > { %2351 = vset.pattern.permute.xlu1 %v2398_v11  ;;  %v541_v11 = vadd.f32 1e-06, %v2557_v5 }
  0x4b   : > { %903 = vperm.xlu1 %2351, %v705_v7   ;;  %v537_v7 = vsel %vm526_vm2, %v517_v33, 0.0 }
  0x4c   : > { %2352 = vset.pattern.permute.xlu2 %v2395_v3  ;;  %v2562_v9 = vadd.f32 %v537_v7, %v536_v6  ;;  %v582_v30 = vand.u32 2147483647, %v541_v11  ;;  %v584_v31 = vand.u32 2147483648, %v541_v11  ;;  %vm578_vm9 = vweird.f32 %v541_v11 }
  0x4e   : > { %3491 = vst [vmem:[#allocation2_spill] sm:$0xff] %v2562_v9  ;;  %v2569_v13 = vadd.f32 1e-06, %v2562_v9  ;;  %vm2611_vm13 = vcmp.eq.f32.partialorder %v582_v30, 8.507059e+37  ;;  %v585_v45 = vor.u32 1.1754944e-38, %v584_v31  ;;  %v694_v30 = vperm.slane %v556_v23, 0 }
  0x50   : > { %v599_v38 = vand.u32 2147483648, %v2569_v13  ;;  %v597_v47 = vand.u32 2147483647, %v2569_v13  ;;  %vm593_vm1 = vweird.f32 %v2569_v13 }
  0x53   : > { %2354 = vset.pattern.permute.xlu1 %v2395_v3  ;;  %v2553_v3 = vadd.f32 %v531_v48, %v530_v43 }
  0x55   : > { %v540_v10 = vadd.f32 1e-06, %v2553_v3 }
  0x57   : > { %2357 = vrcp.f32 %v540_v10  ;;  %v567_v28 = vand.u32 2147483647, %v540_v10  ;;  %v569_v29 = vand.u32 2147483648, %v540_v10  ;;  %vm563_vm5 = vweird.f32 %v540_v10 }
  0x58   : > { %2359 = vrcp.f32 %v541_v11 }
  0x59   : > { %2361 = vrcp.f32 %v2569_v13  ;;  %vm2601_vm10 = vcmp.eq.f32.partialorder %v567_v28, 8.507059e+37  ;;  %v570_v42 = vor.u32 1.1754944e-38, %v569_v29  ;;  %v692_v29 = vsel %vm681_vm15, %v672_v19, 0.0 }
  0x5d   : > { %v2574_v15 = vpop.eup %2357 }
  0x5e   : > { %v2576_v16 = vpop.eup %2359  ;;  %v559_v20 = vmul.f32 %v2574_v15, %v540_v10  ;;  %vm564_vm8 = vweird.f32 %v2574_v15  ;;  %v600_v10 = vor.u32 1.1754944e-38, %v599_v38 }
  0x5f   : > { %v2580_v18 = vpop.eup %2361  ;;  %v574_v21 = vmul.f32 %v2576_v16, %v541_v11  ;;  %vm579_vm11 = vweird.f32 %v2576_v16  ;;  %vm2624_vm14 = vmor %vm563_vm5, %vm564_vm8  ;;  %v664_v11 = vld.sshfl [vmem:[#allocation1 + $0x18] sm:$0xff pattern:$0x75316420]  ;;  %vm2652_vm5 = vcmp.eq.f32.partialorder %v597_v47, 8.507059e+37 }
  0x60   : > { %v589_v22 = vmul.f32 %v2580_v18, %v2569_v13  ;;  %v560_v24 = vsub.f32 1.0, %v559_v20  ;;  %vm2630_vm0 = vmor %vm578_vm9, %vm579_vm11  ;;  %vm594_vm3 = vweird.f32 %v2580_v18  ;;  %v683_v20 = vsel %vm681_vm15, %v669_v57, 0.0 }
  0x61   : > { %v575_v25 = vsub.f32 1.0, %v574_v21  ;;  %vm2648_vm4 = vmor %vm593_vm1, %vm594_vm3  ;;  %v686_v21 = vsel %vm681_vm15, %v670_v59, 0.0  ;;  %v691_v28 = vsel %vm681_vm15, %v664_v11, 0.0  ;;  %vm1078_vm3 = vcmask 261120  }
  0x62   : > { %v590_v32 = vsub.f32 1.0, %v589_v22  ;;  %v561_v35 = vmul.f32 %v2574_v15, %v560_v24  ;;  %v689_v22 = vsel %vm681_vm15, %v671_v62, 0.0  ;;  %v693_v40 = vadd.f32 %v692_v29, %v691_v28 }
  0x63   : > { %v576_v36 = vmul.f32 %v2576_v16, %v575_v25 }
  0x64   : > { %v591_v46 = vmul.f32 %v2580_v18, %v590_v32  ;;  %v562_v50 = vadd.f32 %v2574_v15, %v561_v35  ;;  %v684_v32 = vadd.f32 %v683_v20, %v682_v14 }
  0x65   : > { %v577_v52 = vadd.f32 %v2576_v16, %v576_v36 }
  0x66   : > { %v592_v58 = vadd.f32 %v2580_v18, %v591_v46  ;;  %v566_v6 = vsel %vm2624_vm14, %v2574_v15, %v562_v50  ;;  %v685_v15 = vsel %vm681_vm15, %v662_v55, 0.0 }
  0x67   : > { %v581_v7 = vsel %vm2630_vm0, %v2576_v16, %v577_v52  ;;  %v688_v16 = vsel %vm681_vm15, %v663_v56, 0.0  ;;  %v571_v24 = vsel %vm2601_vm10, %v570_v42, %v566_v6  ;;  %v687_v34 = vadd.f32 %v686_v21, %v685_v15 }
  0x68   : > { %v2566_v12 = vpop.permute.xlu2 %757  ;;  %v586_v25 = vsel %vm2611_vm13, %v585_v45, %v581_v7  ;;  %v596_v26 = vsel %vm2648_vm4, %v2580_v18, %v592_v58  ;;  %v695_v31 = vperm.slane %v571_v24, 0  ;;  %v690_v35 = vadd.f32 %v689_v22, %v688_v16 }
  0x69   : > { %v696_v36 = vperm.slane %v586_v25, 0  ;;  %v601_v38 = vsel %vm2652_vm5, %v600_v10, %v596_v26  ;;  %v698_v18 = vmul.f32 %v694_v30, %v684_v32  ;;  %v633_v45 = vmul.f32 %v2542_v60, %v556_v23 }
  0x6a   : > { %v697_v41 = vperm.slane %v601_v38, 0  ;;  %v699_v43 = vmul.f32 %v695_v31, %v687_v34  ;;  %v634_v46 = vmul.f32 %v2544_v61, %v571_v24  ;;  %v635_v47 = vmul.f32 %v2550_v1, %v586_v25 }
  0x6b   : > { %v700_v44 = vmul.f32 %v696_v36, %v690_v35  ;;  %v636_v49 = vmul.f32 %v2555_v4, %v601_v38  ;;  %v2683_v51 = vperm.slane %v698_v18, 0  ;;  %v2689_v54 = vperm.slane %v633_v45, 0 }
  0x6c   : > { %v701_v50 = vmul.f32 %v697_v41, %v693_v40  ;;  %v2685_v52 = vperm.slane %v699_v43, 0  ;;  %v2691_v56 = vperm.slane %v634_v46, 0  ;;  %v2693_v57 = vperm.slane %v635_v47, 0 }
  0x6d   : > { %v2687_v53 = vperm.slane %v700_v44, 0  ;;  %v2695_v60 = vperm.slane %v636_v49, 0  ;;  %v2697_v61 = vperm.slane %v698_v18, 1  ;;  %v2701_v4 = vperm.slane %v699_v43, 1 }
  0x6e   : > { %v2699_v1 = vperm.slane %v701_v50, 0  ;;  %v2703_v58 = vperm.slane %v700_v44, 1  ;;  %v2705_v62 = vperm.slane %v698_v18, 2  ;;  %v2723_v14 = vperm.slane %v701_v50, 1 }
  0x6f   : > { %v2735_v22 = vperm.slane %v699_v43, 2  ;;  %v2737_v23 = vperm.slane %v700_v44, 2  ;;  %v2739_v24 = vperm.slane %v701_v50, 2 }
  0x72   : > { %v2578_v17 = vpop.permute.xlu2 %787 }
  0x73   : > { %v806_v11 = vmul.f32 %v2683_v51, %v2578_v17  ;;  %v807_v13 = vmul.f32 %v2685_v52, %v2578_v17  ;;  %v808_v19 = vmul.f32 %v2687_v53, %v2578_v17  ;;  %v809_v16 = vmul.f32 %v2699_v1, %v2578_v17 }
  0x7b   : > { %v2599_v39 = vpop.permute.xlu2 %762 }
  0x81   : > { %v2587_v33 = vpop.permute.xlu1 %722  ;;  %v2617_v48 = vpop.permute.xlu0 %712 }
  0x82   : > { %v734_v2 = vmul.f32 %v2689_v54, %v2617_v48  ;;  %v735_v6 = vmul.f32 %v2691_v56, %v2617_v48  ;;  %v736_v7 = vmul.f32 %v2693_v57, %v2617_v48  ;;  %v737_v8 = vmul.f32 %v2695_v60, %v2617_v48 }
  0x83   : > { %v742_v20 = vmul.f32 %v2689_v54, %v2587_v33  ;;  %v743_v15 = vmul.f32 %v2691_v56, %v2587_v33  ;;  %v744_v48 = vmul.f32 %v2693_v57, %v2587_v33  ;;  %v745_v21 = vmul.f32 %v2695_v60, %v2587_v33 }
  0x84   : > { %v2671_v27 = vpop.permute.xlu2 %839 }
  0x85   : > { %v778_v32 = vadd.f32 %v2599_v39, %v742_v20  ;;  %v779_v34 = vadd.f32 %v2599_v39, %v743_v15  ;;  %v780_v35 = vadd.f32 %v2599_v39, %v744_v48  ;;  %v781_v36 = vadd.f32 %v2599_v39, %v745_v21 }
  0x86   : > { %v858_v38 = vmul.f32 %v2697_v61, %v2671_v27  ;;  %v860_v40 = vmul.f32 %v2703_v58, %v2671_v27 }
  0x89   : > { %v2637_v63 = vpop.permute.xlu1 %752  ;;  %v718_v37 = vpop.permute.xlu0 %717 }
  0x8a   : > { %v770_v25 = vadd.f32 %v2637_v63, %v734_v2  ;;  %v771_v26 = vadd.f32 %v2637_v63, %v735_v6  ;;  %v772_v28 = vadd.f32 %v2637_v63, %v736_v7  ;;  %v773_v29 = vadd.f32 %v2637_v63, %v737_v8 }
  0x8b   : > { %v738_v30 = vmul.f32 %v2689_v54, %v718_v37  ;;  %v739_v33 = vmul.f32 %v2691_v56, %v718_v37  ;;  %v740_v17 = vmul.f32 %v2693_v57, %v718_v37  ;;  %v741_v31 = vmul.f32 %v2695_v60, %v718_v37 }
  0x8c   : > { %v859_v63 = vmul.f32 %v2701_v4, %v2671_v27  ;;  %v861_v37 = vmul.f32 %v2723_v14, %v2671_v27  ;;  %v822_v18 = vadd.f32 %v806_v11, %v770_v25  ;;  %v823_v43 = vadd.f32 %v807_v13, %v771_v26 }
  0x8d   : > { %v800_v55 = vpop.permute.xlu2 %799  ;;  %v824_v44 = vadd.f32 %v808_v19, %v772_v28  ;;  %v825_v45 = vadd.f32 %v809_v16, %v773_v29  ;;  %v774_v46 = vadd.f32 %v2566_v12, %v738_v30  ;;  %v775_v39 = vadd.f32 %v2566_v12, %v739_v33 }
  0x8e   : > { %v776_v47 = vadd.f32 %v2566_v12, %v740_v17  ;;  %v777_v49 = vadd.f32 %v2566_v12, %v741_v31  ;;  %v2772_v11 = vmul.f32 %v2683_v51, %v800_v55  ;;  %v2775_v13 = vmul.f32 %v2685_v52, %v800_v55 }
  0x8f   : > { %v2778_v19 = vmul.f32 %v2687_v53, %v800_v55  ;;  %v2781_v12 = vmul.f32 %v2699_v1, %v800_v55  ;;  %v874_v20 = vadd.f32 %v858_v38, %v822_v18  ;;  %v875_v15 = vadd.f32 %v859_v63, %v823_v43 }
  0x90   : > { %v876_v48 = vadd.f32 %v860_v40, %v824_v44  ;;  %v877_v21 = vadd.f32 %v861_v37, %v825_v45 }
  0x91   : > { %v2677_v42 = vpop.permute.xlu1 %727 }
  0x92   : > { %v792_v59 = vpop.permute.xlu0 %791  ;;  %v746_v40 = vmul.f32 %v2689_v54, %v2677_v42  ;;  %v748_v37 = vmul.f32 %v2693_v57, %v2677_v42 }
  0x93   : > { %v810_v16 = vmul.f32 %v2683_v51, %v792_v59  ;;  %v811_v25 = vmul.f32 %v2685_v52, %v792_v59  ;;  %v812_v26 = vmul.f32 %v2687_v53, %v792_v59  ;;  %v813_v28 = vmul.f32 %v2699_v1, %v792_v59 }
  0x94   : > { %v747_v59 = vmul.f32 %v2691_v56, %v2677_v42 }
  0x95   : > { %v828_v18 = vadd.f32 %v812_v26, %v776_v47  ;;  %v829_v43 = vadd.f32 %v813_v28, %v777_v49 }
  0x96   : > { %v892_v41 = vpop.permute.xlu2 %891 }
  0x97   : > { %v910_v6 = vmul.f32 %v2705_v62, %v892_v41  ;;  %v911_v27 = vmul.f32 %v2735_v22, %v892_v41  ;;  %v912_v7 = vmul.f32 %v2737_v23, %v892_v41  ;;  %v913_v8 = vmul.f32 %v2739_v24, %v892_v41 }
  0x98   : > { %v826_v41 = vadd.f32 %v810_v16, %v774_v46 }
  0x99   : > { %v926_v29 = vadd.f32 %v910_v6, %v874_v20  ;;  %v927_v30 = vadd.f32 %v911_v27, %v875_v15  ;;  %v928_v33 = vadd.f32 %v912_v7, %v876_v48  ;;  %v929_v17 = vadd.f32 %v913_v8, %v877_v21 }
  0x9a   : > { %v2715_v10 = vpop.permute.xlu1 %795 }
  0x9b   : > { %v844_v50 = vpop.permute.xlu0 %843  ;;  %v814_v55 = vmul.f32 %v2683_v51, %v2715_v10  ;;  %v815_v31 = vmul.f32 %v2685_v52, %v2715_v10  ;;  %v816_v38 = vmul.f32 %v2687_v53, %v2715_v10  ;;  %v817_v63 = vmul.f32 %v2699_v1, %v2715_v10 }
  0x9c   : > { %v749_v51 = vmul.f32 %v2695_v60, %v2677_v42  ;;  %v827_v52 = vadd.f32 %v811_v25, %v775_v39  ;;  %v2803_v53 = vmax.f32 %v926_v29, 0.0  ;;  %v2805_v44 = vmax.f32 %v927_v30, 0.0 }
  0x9d   : > { %v2807_v1 = vmax.f32 %v928_v33, 0.0  ;;  %v2809_v54 = vmax.f32 %v929_v17, 0.0  ;;  %v830_v56 = vadd.f32 %v814_v55, %v778_v32  ;;  %v831_v45 = vadd.f32 %v815_v31, %v779_v34 }
  0x9e   : > { %v832_v6 = vadd.f32 %v816_v38, %v780_v35  ;;  %v833_v57 = vadd.f32 %v817_v63, %v781_v36  ;;  %v862_v42 = vmul.f32 %v2697_v61, %v844_v50  ;;  %v863_v60 = vmul.f32 %v2701_v4, %v844_v50  ;;  %v900_v47 = vpop.permute.xlu2 %899 }
  0x9f   : > { %v864_v46 = vmul.f32 %v2703_v58, %v844_v50  ;;  %v865_v39 = vmul.f32 %v2723_v14, %v844_v50  ;;  %v918_v15 = vmul.f32 %v2705_v62, %v900_v47  ;;  %v919_v50 = vmul.f32 %v2735_v22, %v900_v47 }
  0xa0   : > { %v920_v48 = vmul.f32 %v2737_v23, %v900_v47  ;;  %v921_v21 = vmul.f32 %v2739_v24, %v900_v47  ;;  %v878_v16 = vadd.f32 %v862_v42, %v826_v41  ;;  %v879_v25 = vadd.f32 %v863_v60, %v827_v52 }
  0xa1   : > { %v880_v26 = vadd.f32 %v864_v46, %v828_v18  ;;  %v881_v28 = vadd.f32 %v865_v39, %v829_v43  ;;  %v959_v9 = vmul.f32 %v2805_v44, %v2805_v44  ;;  %v960_v41 = vmul.f32 %v2807_v1, %v2807_v1 }
  0xa2   : > { %v961_v52 = vmul.f32 %v2809_v54, %v2809_v54 }
  0xa3   : > { %v2765_v2 = vpop.permute.xlu1 %767 }
  0xa4   : > { %v896_v27 = vpop.permute.xlu0 %895  ;;  %v782_v18 = vadd.f32 %v2765_v2, %v746_v40  ;;  %v783_v43 = vadd.f32 %v2765_v2, %v747_v59 }
  0xa5   : > { %v914_v34 = vmul.f32 %v2705_v62, %v896_v27  ;;  %v915_v35 = vmul.f32 %v2735_v22, %v896_v27  ;;  %v916_v36 = vmul.f32 %v2737_v23, %v896_v27  ;;  %v917_v20 = vmul.f32 %v2739_v24, %v896_v27 }
  0xa6   : > { %v958_v27 = vmul.f32 %v2803_v53, %v2803_v53 }
  0xa7   : > { %v930_v55 = vadd.f32 %v914_v34, %v878_v16  ;;  %v931_v31 = vadd.f32 %v915_v35, %v879_v25  ;;  %v932_v38 = vadd.f32 %v916_v36, %v880_v26  ;;  %v933_v63 = vadd.f32 %v917_v20, %v881_v28 }
  0xa9   : > { %v2839_v46 = vmax.f32 %v930_v55, 0.0  ;;  %v2841_v39 = vmax.f32 %v931_v31, 0.0  ;;  %v2843_v47 = vmax.f32 %v932_v38, 0.0 }
  0xac   : > { %v848_v10 = vpop.permute.xlu1 %847 }
  0xad   : > { %v866_v49 = vmul.f32 %v2697_v61, %v848_v10  ;;  %v867_v7 = vmul.f32 %v2701_v4, %v848_v10  ;;  %v868_v8 = vmul.f32 %v2703_v58, %v848_v10  ;;  %v869_v32 = vmul.f32 %v2723_v14, %v848_v10 }
  0xaf   : > { %v882_v29 = vadd.f32 %v866_v49, %v830_v56  ;;  %v883_v30 = vadd.f32 %v867_v7, %v831_v45  ;;  %v884_v33 = vadd.f32 %v868_v8, %v832_v6  ;;  %v885_v17 = vadd.f32 %v869_v32, %v833_v57 }
  0xb0   : > { %v784_v56 = vadd.f32 %v2765_v2, %v748_v37  ;;  %v785_v45 = vadd.f32 %v2765_v2, %v749_v51  ;;  %v2845_v49 = vmax.f32 %v933_v63, 0.0  ;;  %v834_v51 = vadd.f32 %v2772_v11, %v782_v18 }
  0xb1   : > { %v934_v6 = vadd.f32 %v918_v15, %v882_v29  ;;  %v935_v57 = vadd.f32 %v919_v50, %v883_v30  ;;  %v936_v42 = vadd.f32 %v920_v48, %v884_v33  ;;  %v937_v60 = vadd.f32 %v921_v21, %v885_v17 }
  0xb2   : > { %v835_v7 = vadd.f32 %v2775_v13, %v783_v43  ;;  %v836_v8 = vadd.f32 %v2778_v19, %v784_v56  ;;  %v837_v32 = vadd.f32 %v2781_v12, %v785_v45  ;;  %v965_v11 = vmul.f32 %v2845_v49, %v2845_v49 }
  0xb3   : > { %v2855_v34 = vmax.f32 %v934_v6, 0.0  ;;  %v2857_v35 = vmax.f32 %v935_v57, 0.0  ;;  %v2859_v36 = vmax.f32 %v936_v42, 0.0 }
  0xb4   : > { %v852_v10 = vpop.permute.xlu1 %851 }
  0xb5   : > { %v870_v40 = vmul.f32 %v2697_v61, %v852_v10  ;;  %v871_v59 = vmul.f32 %v2701_v4, %v852_v10  ;;  %v872_v37 = vmul.f32 %v2703_v58, %v852_v10  ;;  %v873_v2 = vmul.f32 %v2723_v14, %v852_v10 }
  0xb6   : > { %v2861_v61 = vmax.f32 %v937_v60, 0.0  ;;  %v962_v4 = vmul.f32 %v2839_v46, %v2839_v46  ;;  %v963_v58 = vmul.f32 %v2841_v39, %v2841_v39  ;;  %v964_v14 = vmul.f32 %v2843_v47, %v2843_v47 }
  0xb7   : > { %v886_v19 = vadd.f32 %v870_v40, %v834_v51  ;;  %v887_v12 = vadd.f32 %v871_v59, %v835_v7  ;;  %v888_v20 = vadd.f32 %v872_v37, %v836_v8  ;;  %v889_v15 = vadd.f32 %v873_v2, %v837_v32 }
  0xb8   : > { %v966_v25 = vmul.f32 %v2855_v34, %v2855_v34  ;;  %v967_v26 = vmul.f32 %v2857_v35, %v2857_v35  ;;  %v968_v28 = vmul.f32 %v2859_v36, %v2859_v36  ;;  %v969_v29 = vmul.f32 %v2861_v61, %v2861_v61 }
  0xb9   : > { %v974_v17 = vadd.f32 %v962_v4, %v958_v27  ;;  %v992_v55 = vadd.f32 %v964_v14, %v960_v41 }
  0xbb   : > { %v975_v18 = vadd.f32 %v974_v17, %v966_v25  ;;  %v993_v56 = vadd.f32 %v992_v55, %v968_v28 }
  0xbd   : > { %v904_v13 = vpop.permute.xlu1 %903 }
  0xbe   : > { %v922_v50 = vmul.f32 %v2705_v62, %v904_v13  ;;  %v923_v48 = vmul.f32 %v2735_v22, %v904_v13  ;;  %v924_v21 = vmul.f32 %v2737_v23, %v904_v13  ;;  %v925_v16 = vmul.f32 %v2739_v24, %v904_v13 }
  0xbf   : > { %v983_v23 = vadd.f32 %v963_v58, %v959_v9  ;;  %v1001_v24 = vadd.f32 %v965_v11, %v961_v52 }
  0xc0   : > { %v938_v30 = vadd.f32 %v922_v50, %v886_v19  ;;  %v939_v62 = vadd.f32 %v923_v48, %v887_v12  ;;  %v940_v33 = vadd.f32 %v924_v21, %v888_v20  ;;  %v941_v22 = vadd.f32 %v925_v16, %v889_v15 }
  0xc1   : > { %v984_v43 = vadd.f32 %v983_v23, %v967_v26  ;;  %v1002_v45 = vadd.f32 %v1001_v24, %v969_v29 }
  0xc2   : > { %v2883_v31 = vmax.f32 %v938_v30, 0.0  ;;  %v2885_v38 = vmax.f32 %v939_v62, 0.0  ;;  %v2887_v63 = vmax.f32 %v940_v33, 0.0  ;;  %v2889_v10 = vmax.f32 %v941_v22, 0.0 }
  0xc4   : > { %v970_v6 = vmul.f32 %v2883_v31, %v2883_v31  ;;  %v971_v9 = vmul.f32 %v2885_v38, %v2885_v38  ;;  %v972_v27 = vmul.f32 %v2887_v63, %v2887_v63  ;;  %v973_v41 = vmul.f32 %v2889_v10, %v2889_v10 }
  0xc6   : > { %v976_v52 = vadd.f32 %v975_v18, %v970_v6  ;;  %v985_v57 = vadd.f32 %v984_v43, %v971_v9  ;;  %v994_v42 = vadd.f32 %v993_v56, %v972_v27  ;;  %v1003_v60 = vadd.f32 %v1002_v45, %v973_v41 }
  0xc8   : > { %v977_v40 = vrot.slane %v976_v52, 4  ;;  %v986_v59 = vrot.slane %v985_v57, 4  ;;  %v995_v37 = vrot.slane %v994_v42, 4  ;;  %v1004_v2 = vrot.slane %v1003_v60, 4 }
  0xca   : > { %v978_v51 = vadd.f32 %v977_v40, %v976_v52  ;;  %v987_v7 = vadd.f32 %v986_v59, %v985_v57  ;;  %v996_v8 = vadd.f32 %v995_v37, %v994_v42  ;;  %v1005_v32 = vadd.f32 %v1004_v2, %v1003_v60 }
  0xcc   : > { %v979_v4 = vrot.slane %v978_v51, 2  ;;  %v988_v58 = vrot.slane %v987_v7, 2  ;;  %v997_v14 = vrot.slane %v996_v8, 2  ;;  %v1006_v11 = vrot.slane %v1005_v32, 2 }
  0xce   : > { %v980_v13 = vadd.f32 %v979_v4, %v978_v51  ;;  %v989_v19 = vadd.f32 %v988_v58, %v987_v7  ;;  %v998_v12 = vadd.f32 %v997_v14, %v996_v8  ;;  %v1007_v20 = vadd.f32 %v1006_v11, %v1005_v32 }
  0xd0   : > { %v981_v15 = vrot.slane %v980_v13, 1  ;;  %v990_v50 = vrot.slane %v989_v19, 1  ;;  %v999_v48 = vrot.slane %v998_v12, 1  ;;  %v1008_v21 = vrot.slane %v1007_v20, 1 }
  0xd2   : > { %v982_v16 = vadd.f32 %v981_v15, %v980_v13  ;;  %v991_v25 = vadd.f32 %v990_v50, %v989_v19  ;;  %v1000_v26 = vadd.f32 %v999_v48, %v998_v12  ;;  %v1009_v28 = vadd.f32 %v1008_v21, %v1007_v20  ;;  %v1271_v15 = vld [vmem:[%s3473_s6 + $0x20] sm:$0xff]  ;;  %v1072_v50 = vld [vmem:[%s3471_s4 + $0x10] sm:$0xff]  ;;  %v1073_v48 = vld [vmem:[%s3471_s4 + $0x18] sm:$0xff] }
  0xd3   : > { %v1274_v21 = vld [vmem:[%s3473_s6 + $0x38] sm:$0xff] }
  0xd4   : > { %v1010_v29 = vadd.f32 1e-06, %v982_v16  ;;  %v1011_v30 = vadd.f32 1e-06, %v991_v25  ;;  %v1012_v62 = vadd.f32 1e-06, %v1000_v26 }
  0xd5   : > { %v1013_v33 = vadd.f32 1e-06, %v1009_v28  ;;  %v1270_v16 = vld [vmem:[%s3473_s6 + $0x18] sm:$0xff]  ;;  %v1273_v25 = vld [vmem:[%s3473_s6 + $0x30] sm:$0xff]  ;;  %v1074_v26 = vld [vmem:[%s3471_s4 + $0x20] sm:$0xff] }
  0xd6   : > { %2363 = vrsqrt.f32 %v1010_v29  ;;  %vm1020_vm8 = vweird.f32 %v1010_v29  ;;  %vm1030_vm11 = vweird.f32 %v1011_v30  ;;  %vm1040_vm14 = vweird.f32 %v1012_v62  ;;  %v1272_v28 = vld [vmem:[%s3473_s6 + $0x28] sm:$0xff] }
  0xd7   : > { %2365 = vrsqrt.f32 %v1011_v30  ;;  %vm1050_vm0 = vweird.f32 %v1013_v33 }
  0xd8   : > { %2367 = vrsqrt.f32 %v1012_v62 }
  0xd9   : > { %2369 = vrsqrt.f32 %v1013_v33 }
  0xdc   : > { %v2364_v22 = vpop.eup %2363 }
  0xdd   : > { %v2366_v17 = vpop.eup %2365  ;;  %v1015_v23 = vmul.f32 %v2364_v22, %v1010_v29  ;;  %vm1021_vm6 = vweird.f32 %v2364_v22  ;;  %v1075_v29 = vld [vmem:[%s3471_s4 + $0x28] sm:$0xff] }
  0xde   : > { %v2368_v55 = vpop.eup %2367  ;;  %v1025_v24 = vmul.f32 %v2366_v17, %v1011_v30  ;;  %vm1031_vm7 = vweird.f32 %v2366_v17  ;;  %vm1022_vm10 = vmor %vm1020_vm8, %vm1021_vm6  ;;  %v1076_v30 = vld [vmem:[%s3471_s4 + $0x30] sm:$0xff] }
  0xdf   : > { %v2370_v18 = vpop.eup %2369  ;;  %v1016_v43 = vmul.f32 %v2364_v22, %v1015_v23  ;;  %v1035_v56 = vmul.f32 %v2368_v55, %v1012_v62  ;;  %vm1041_vm9 = vweird.f32 %v2368_v55  ;;  %vm1032_vm13 = vmor %vm1030_vm11, %vm1031_vm7  ;;  %v1077_v62 = vld [vmem:[%s3471_s4 + $0x38] sm:$0xff] }
  0xe0   : > { %v1026_v45 = vmul.f32 %v2366_v17, %v1025_v24  ;;  %v1045_v6 = vmul.f32 %v2370_v18, %v1013_v33  ;;  %vm1051_vm12 = vweird.f32 %v2370_v18  ;;  %vm1042_vm15 = vmor %vm1040_vm14, %vm1041_vm9 }
  0xe1   : > { %v1017_v9 = vmul.f32 0.5, %v1016_v43  ;;  %v1036_v27 = vmul.f32 %v2368_v55, %v1035_v56  ;;  %vm1052_vm1 = vmor %vm1050_vm0, %vm1051_vm12 }
  0xe2   : > { %v1027_v41 = vmul.f32 0.5, %v1026_v45  ;;  %v1046_v52 = vmul.f32 %v2370_v18, %v1045_v6 }
  0xe3   : > { %v1018_v57 = vsub.f32 1.5, %v1017_v9  ;;  %v1037_v42 = vmul.f32 0.5, %v1036_v27 }
  0xe4   : > { %v1028_v60 = vsub.f32 1.5, %v1027_v41  ;;  %v1047_v40 = vmul.f32 0.5, %v1046_v52 }
  0xe5   : > { %v1019_v59 = vmul.f32 %v2364_v22, %v1018_v57  ;;  %v1038_v37 = vsub.f32 1.5, %v1037_v42 }
  0xe6   : > { %v1029_v2 = vmul.f32 %v2366_v17, %v1028_v60  ;;  %v1048_v51 = vsub.f32 1.5, %v1047_v40 }
  0xe7   : > { %v1023_v7 = vsel %vm1022_vm10, %v2364_v22, %v1019_v59  ;;  %v1039_v8 = vmul.f32 %v2368_v55, %v1038_v37 }
  0xe8   : > { %v2900_v32 = vmul.f32 %v1023_v7, %v2883_v31  ;;  %v1033_v4 = vsel %vm1032_vm13, %v2366_v17, %v1029_v2  ;;  %v1049_v58 = vmul.f32 %v2370_v18, %v1048_v51  ;;  %v2910_v12 = vmul.f32 %v1023_v7, %v2855_v34 }
  0xe9   : > { %v2903_v14 = vmul.f32 %v1033_v4, %v2885_v38  ;;  %v1043_v11 = vsel %vm1042_vm15, %v2368_v55, %v1039_v8  ;;  %v2917_v20 = vmul.f32 %v1033_v4, %v2857_v35  ;;  %v2933_v35 = vmul.f32 %v1033_v4, %v2841_v39 }
  0xea   : > { %3508 = vst [vmem:[#allocation3_spill] sm:$0xff] %v2900_v32  ;;  %1115 = vmatpush.msra.mxu0 %v2900_v32  ;;  %v2907_v13 = vmul.f32 %v1043_v11, %v2887_v63  ;;  %v1053_v19 = vsel %vm1052_vm1, %v2370_v18, %v1049_v58  ;;  %v2922_v38 = vmul.f32 %v1043_v11, %v2859_v36 }
  0xeb   : > { %3510 = vst [vmem:[#allocation5_spill] sm:$0xff] %v2910_v12  ;;  %1156 = vmatpush.msra.mxu1 %v2903_v14  ;;  %v2914_v31 = vmul.f32 %v1053_v19, %v2889_v10  ;;  %v2925_v63 = vmul.f32 %v1023_v7, %v2839_v46  ;;  %v2930_v34 = vmul.f32 %v1053_v19, %v2861_v61  ;;  %v1070_v10 = vld [vmem:[%s3471_s4] sm:$0xff] }
  0xec   : > { %3509 = vst [vmem:[#allocation4_spill] sm:$0xff] %v2907_v13  ;;  %1197 = vmatpush.msra.mxu2 %v2907_v13  ;;  %1116 = vmatpush.msra.mxu0 %v2910_v12  ;;  %v2938_v36 = vmul.f32 %v1043_v11, %v2843_v47  ;;  %v2941_v46 = vmul.f32 %v1023_v7, %v2803_v53 }
  0xed   : > { %3511 = vst [vmem:[#allocation6_spill] sm:$0xff] %v2914_v31  ;;  %1238 = vmatpush.msra.mxu3 %v2914_v31  ;;  %1157 = vmatpush.msra.mxu1 %v2917_v20  ;;  %v2946_v61 = vmul.f32 %v1053_v19, %v2845_v49  ;;  %v2949_v39 = vmul.f32 %v1033_v4, %v2805_v44  ;;  %v1268_v44 = vld [vmem:[%s3473_s6 + $0x8] sm:$0xff]  ;;  %v1267_v49 = vld [vmem:[%s3473_s6] sm:$0xff] }
  0xee   : > { %3512 = vst [vmem:[#allocation7_spill] sm:$0xff] %v2922_v38  ;;  %1198 = vmatpush.msra.mxu2 %v2922_v38  ;;  %1117 = vmatpush.msra.mxu0 %v2925_v63  ;;  %v2957_v53 = vmul.f32 %v1043_v11, %v2807_v1  ;;  %v2962_v47 = vmul.f32 %v1053_v19, %v2809_v54  ;;  %v1269_v1 = vld [vmem:[%s3473_s6 + $0x10] sm:$0xff]  ;;  %v1071_v54 = vld [vmem:[%s3471_s4 + $0x8] sm:$0xff] }
  0xef   : > { %3513 = vst [vmem:[#allocation8_spill] sm:$0xff] %v2930_v34  ;;  %1239 = vmatpush.msra.mxu3 %v2930_v34  ;;  %1158 = vmatpush.msra.mxu1 %v2933_v35 }
  0xf0   : > { %3514 = vst [vmem:[#allocation9_spill] sm:$0xff] %v2938_v36  ;;  %1199 = vmatpush.msra.mxu2 %v2938_v36  ;;  %1118 = vmatpush.msra.mxu0 %v2941_v46 }
  0xf1   : > { %3515 = vst [vmem:[#allocation10_spill] sm:$0xff] %v2941_v46  ;;  %1240 = vmatpush.msra.mxu3 %v2946_v61  ;;  %1159 = vmatpush.msra.mxu1 %v2949_v39 }
  0xf2   : > { %3516 = vst [vmem:[#allocation11_spill] sm:$0xff] %v2946_v61  ;;  %1200 = vmatpush.msra.mxu2 %v2957_v53  ;;  %2171 = vmatmul.msk.f32.vlgmr.msra.gmra.mxu0 %vm1078_vm3, %v1070_v10 }
  0xf3   : > { %3517 = vst [vmem:[#allocation12_spill] sm:$0xff] %v2957_v53  ;;  %1241 = vmatpush.msra.mxu3 %v2962_v47  ;;  %2179 = vmatmul.msk.f32.vlgmr.msra.gmra.mxu1 %vm1078_vm3, %v1070_v10 }
  0xf4   : > { %3518 = vst [vmem:[#allocation13_spill] sm:$0xff] %v2962_v47  ;;  %2187 = vmatmul.msk.f32.vlgmr.msra.gmra.mxu2 %vm1078_vm3, %v1070_v10  ;;  %2195 = vmatmul.msk.f32.vlgmr.msra.gmra.mxu3 %vm1078_vm3, %v1070_v10 }
  0xf5   : > { %1314 = vperm.xlu0 %2353, %v1268_v44   ;;  %1319 = vperm.xlu1 %2354, %v1269_v1  }
  0xf6   : > { %1309 = vperm.xlu2 %2352, %v1267_v49  }
  0xfa   : > { %2172 = vmatmul.msk.f32.gmra.mxu0 %vm1078_vm3, %v1071_v54 }
  0xfb   : > { %2180 = vmatmul.msk.f32.gmra.mxu1 %vm1078_vm3, %v1071_v54 }
  0xfc   : > { %2188 = vmatmul.msk.f32.gmra.mxu2 %vm1078_vm3, %v1071_v54  ;;  %2196 = vmatmul.msk.f32.gmra.mxu3 %vm1078_vm3, %v1071_v54 }
  0xfd   : > { %1329 = vperm.xlu1 %2354, %v1271_v15   ;;  %1339 = vperm.xlu0 %2353, %v1273_v25  }
  0xfe   : > { %1324 = vperm.xlu2 %2352, %v1270_v16  }
 0x102   : > { %2173 = vmatmul.msk.f32.gmra.mxu0 %vm1078_vm3, %v1072_v50 }
 0x103   : > { %2181 = vmatmul.msk.f32.gmra.mxu1 %vm1078_vm3, %v1072_v50 }
 0x104   : > { %2189 = vmatmul.msk.f32.gmra.mxu2 %vm1078_vm3, %v1072_v50  ;;  %2197 = vmatmul.msk.f32.gmra.mxu3 %vm1078_vm3, %v1072_v50 }
 0x105   : > { %1344 = vperm.xlu1 %2354, %v1274_v21  }
 0x106   : > { %1334 = vperm.xlu2 %2352, %v1272_v28  }
 0x10a   : > { %2174 = vmatmul.msk.f32.gmra.mxu0 %vm1078_vm3, %v1073_v48 }
 0x10b   : > { %2182 = vmatmul.msk.f32.gmra.mxu1 %vm1078_vm3, %v1073_v48 }
 0x10c   : > { %2190 = vmatmul.msk.f32.gmra.mxu2 %vm1078_vm3, %v1073_v48  ;;  %2198 = vmatmul.msk.f32.gmra.mxu3 %vm1078_vm3, %v1073_v48 }
 0x112   : > { %2175 = vmatmul.msk.f32.gmra.mxu0 %vm1078_vm3, %v1074_v26 }
 0x113   : > { %2183 = vmatmul.msk.f32.gmra.mxu1 %vm1078_vm3, %v1074_v26 }
 0x114   : > { %2191 = vmatmul.msk.f32.gmra.mxu2 %vm1078_vm3, %v1074_v26  ;;  %2199 = vmatmul.msk.f32.gmra.mxu3 %vm1078_vm3, %v1074_v26 }
 0x11a   : > { %2176 = vmatmul.msk.f32.gmra.mxu0 %vm1078_vm3, %v1075_v29 }
 0x11b   : > { %2184 = vmatmul.msk.f32.gmra.mxu1 %vm1078_vm3, %v1075_v29 }
 0x11c   : > { %2192 = vmatmul.msk.f32.gmra.mxu2 %vm1078_vm3, %v1075_v29  ;;  %2200 = vmatmul.msk.f32.gmra.mxu3 %vm1078_vm3, %v1075_v29 }
 0x122   : > { %2177 = vmatmul.msk.f32.gmra.mxu0 %vm1078_vm3, %v1076_v30 }
 0x123   : > { %2185 = vmatmul.msk.f32.gmra.mxu1 %vm1078_vm3, %v1076_v30 }
 0x124   : > { %2193 = vmatmul.msk.f32.gmra.mxu2 %vm1078_vm3, %v1076_v30  ;;  %2201 = vmatmul.msk.f32.gmra.mxu3 %vm1078_vm3, %v1076_v30 }
 0x12a   : > { %2178 = vmatmul.msk.f32.gmra.mxu0 %vm1078_vm3, %v1077_v62 }
 0x12b   : > { %2186 = vmatmul.msk.f32.gmra.mxu1 %vm1078_vm3, %v1077_v62 }
 0x12c   : > { %2194 = vmatmul.msk.f32.gmra.mxu2 %vm1078_vm3, %v1077_v62  ;;  %2202 = vmatmul.msk.f32.gmra.mxu3 %vm1078_vm3, %v1077_v62 }
 0x150   : > { %v1310_v40 = vpop.permute.xlu2 %1309 }
 0x158   : > { %v1325_v49 = vpop.permute.xlu2 %1324 }
 0x167   : > { %v1315_v2 = vpop.permute.xlu0 %1314  ;;  %v1320_v51 = vpop.permute.xlu1 %1319 }
 0x16f   : > { %v1120_v33 = vpop.f32.mrf.mxu0 }
 0x170   : > { %v1161_v22 = vpop.f32.mrf.mxu1  ;;  %v1275_v59 = vmul.f32 2.0, %v1120_v33 }
 0x171   : > { %v1276_v7 = vmul.f32 2.0, %v1161_v22 }
 0x172   : > { %v3043_v10 = vsub.f32 %v1310_v40, %v1275_v59 }
 0x173   : > { %v3047_v50 = vsub.f32 %v1310_v40, %v1276_v7 }
 0x177   : > { %v1202_v17 = vpop.f32.mrf.mxu2  ;;  %v1243_v23 = vpop.f32.mrf.mxu3 }
 0x178   : > { %v1123_v55 = vpop.f32.mrf.mxu0  ;;  %v1164_v24 = vpop.f32.mrf.mxu1  ;;  %v1277_v15 = vmul.f32 2.0, %v1202_v17  ;;  %v1278_v48 = vmul.f32 2.0, %v1243_v23 }
 0x179   : > { %v1279_v37 = vmul.f32 2.0, %v1123_v55  ;;  %v1280_v58 = vmul.f32 2.0, %v1164_v24  ;;  %v1330_v55 = vpop.permute.xlu1 %1329 }
 0x17a   : > { %v3057_v17 = vsub.f32 %v1310_v40, %v1277_v15 }
 0x17b   : > { %v3045_v44 = vsub.f32 %v1315_v2, %v1279_v37  ;;  %v3049_v21 = vsub.f32 %v1315_v2, %v1280_v58 }
 0x17d   : > { %v1379_v26 = vmin.f32 %v3043_v10, %v3045_v44 }
 0x17f   : > { %v1205_v18 = vpop.f32.mrf.mxu2  ;;  %v1246_v43 = vpop.f32.mrf.mxu3 }
 0x180   : > { %v1126_v56 = vpop.f32.mrf.mxu0  ;;  %v1167_v45 = vpop.f32.mrf.mxu1  ;;  %v1281_v16 = vmul.f32 2.0, %v1205_v18  ;;  %v1282_v25 = vmul.f32 2.0, %v1246_v43  ;;  %v3059_v18 = vsub.f32 %v1310_v40, %v1278_v48  ;;  %v1392_v43 = vmin.f32 %v3047_v50, %v3049_v21 }
 0x181   : > { %v1283_v1 = vmul.f32 2.0, %v1126_v56  ;;  %v1284_v54 = vmul.f32 2.0, %v1167_v45  ;;  %v1345_v13 = vpop.permute.xlu1 %1344 }
 0x183   : > { %v3053_v30 = vsub.f32 %v1320_v51, %v1283_v1  ;;  %v3055_v62 = vsub.f32 %v1320_v51, %v1284_v54  ;;  %v1335_v54 = vpop.permute.xlu2 %1334 }
 0x185   : > { %v1393_v40 = vmin.f32 %v1392_v43, %v3055_v62 }
 0x187   : > { %v1208_v6 = vpop.f32.mrf.mxu2  ;;  %v1249_v9 = vpop.f32.mrf.mxu3 }
 0x188   : > { %v1129_v27 = vpop.f32.mrf.mxu0  ;;  %v1170_v41 = vpop.f32.mrf.mxu1  ;;  %v1285_v33 = vmul.f32 2.0, %v1208_v6  ;;  %v1286_v22 = vmul.f32 2.0, %v1249_v9 }
 0x189   : > { %v1287_v28 = vmul.f32 2.0, %v1129_v27  ;;  %v1288_v29 = vmul.f32 2.0, %v1170_v41  ;;  %v3063_v27 = vsub.f32 %v1315_v2, %v1281_v16  ;;  %v3065_v41 = vsub.f32 %v1315_v2, %v1282_v25 }
 0x18a   : > { %v3073_v58 = vsub.f32 %v1320_v51, %v1285_v33  ;;  %v3075_v1 = vsub.f32 %v1320_v51, %v1286_v22 }
 0x18b   : > { %v3067_v6 = vsub.f32 %v1325_v49, %v1287_v28  ;;  %v3069_v9 = vsub.f32 %v1325_v49, %v1288_v29  ;;  %v1405_v25 = vmin.f32 %v3057_v17, %v3063_v27  ;;  %v1340_v28 = vpop.permute.xlu0 %1339 }
 0x18d   : > { %v1394_v51 = vmin.f32 %v1393_v40, %v3069_v9 }
 0x18f   : > { %v1211_v52 = vpop.f32.mrf.mxu2  ;;  %v1252_v57 = vpop.f32.mrf.mxu3 }
 0x190   : > { %v1132_v42 = vpop.f32.mrf.mxu0  ;;  %v1173_v60 = vpop.f32.mrf.mxu1 }
 0x191   : > { %v1291_v24 = vmul.f32 2.0, %v1132_v42  ;;  %v1292_v23 = vmul.f32 2.0, %v1173_v60  ;;  %v1380_v60 = vmin.f32 %v1379_v26, %v3053_v30  ;;  %v1290_v26 = vmul.f32 2.0, %v1252_v57 }
 0x193   : > { %v3077_v15 = vsub.f32 %v1330_v55, %v1291_v24  ;;  %v3079_v2 = vsub.f32 %v1330_v55, %v1292_v23  ;;  %v1381_v29 = vmin.f32 %v1380_v60, %v3067_v6  ;;  %v1406_v24 = vmin.f32 %v1405_v25, %v3073_v58 }
 0x197   : > { %v1214_v8 = vpop.f32.mrf.mxu2  ;;  %v1255_v4 = vpop.f32.mrf.mxu3 }
 0x198   : > { %v1135_v11 = vpop.f32.mrf.mxu0  ;;  %v1176_v19 = vpop.f32.mrf.mxu1  ;;  %v1293_v43 = vmul.f32 2.0, %v1214_v8 }
 0x199   : > { %v1295_v7 = vmul.f32 2.0, %v1135_v11  ;;  %v1296_v42 = vmul.f32 2.0, %v1176_v19  ;;  %v1418_v11 = vmin.f32 %v3059_v18, %v3065_v41  ;;  %v1289_v19 = vmul.f32 2.0, %v1211_v52 }
 0x19a   : > { %v1395_v52 = vmin.f32 %v1394_v51, %v3079_v2 }
 0x19b   : > { %v3087_v33 = vsub.f32 %v1335_v54, %v1295_v7  ;;  %v3089_v22 = vsub.f32 %v1335_v54, %v1296_v42  ;;  %v1419_v23 = vmin.f32 %v1418_v11, %v3075_v1  ;;  %v3099_v7 = vsub.f32 %v1325_v49, %v1289_v19 }
 0x19c   : > { %v3101_v42 = vsub.f32 %v1325_v49, %v1290_v26 }
 0x19f   : > { %v1217_v56 = vpop.f32.mrf.mxu2  ;;  %v1258_v45 = vpop.f32.mrf.mxu3 }
 0x1a0   : > { %v1138_v59 = vpop.f32.mrf.mxu0  ;;  %v1179_v37 = vpop.f32.mrf.mxu1  ;;  %v1297_v34 = vmul.f32 2.0, %v1217_v56  ;;  %v1298_v25 = vmul.f32 2.0, %v1258_v45 }
 0x1a1   : > { %v1299_v48 = vmul.f32 2.0, %v1138_v59  ;;  %v1300_v16 = vmul.f32 2.0, %v1179_v37  ;;  %v1294_v59 = vmul.f32 2.0, %v1255_v4  ;;  %v1382_v37 = vmin.f32 %v1381_v29, %v3077_v15 }
 0x1a2   : > { %v1396_v4 = vmin.f32 %v1395_v52, %v3089_v22  ;;  %v3117_v52 = vsub.f32 %v1335_v54, %v1297_v34 }
 0x1a3   : > { %v3095_v57 = vsub.f32 %v1340_v28, %v1299_v48  ;;  %v3097_v31 = vsub.f32 %v1340_v28, %v1300_v16  ;;  %v1383_v8 = vmin.f32 %v1382_v37, %v3087_v33  ;;  %v3105_v48 = vsub.f32 %v1330_v55, %v1293_v43 }
 0x1a4   : > { %v3107_v16 = vsub.f32 %v1330_v55, %v1294_v59  ;;  %v1407_v37 = vmin.f32 %v1406_v24, %v3099_v7  ;;  %v3119_v43 = vsub.f32 %v1335_v54, %v1298_v25 }
 0x1a5   : > { %v1384_v49 = vmin.f32 %v1383_v8, %v3095_v57  ;;  %v1397_v56 = vmin.f32 %v1396_v4, %v3097_v31 }
 0x1a7   : > { %v1220_v60 = vpop.f32.mrf.mxu2  ;;  %v1261_v40 = vpop.f32.mrf.mxu3 }
 0x1a8   : > { %v1141_v47 = vpop.f32.mrf.mxu0  ;;  %v1182_v11 = vpop.f32.mrf.mxu1  ;;  %v1301_v61 = vmul.f32 2.0, %v1220_v60  ;;  %v1302_v19 = vmul.f32 2.0, %v1261_v40  ;;  %v1408_v40 = vmin.f32 %v1407_v37, %v3105_v48 }
 0x1a9   : > { %v1303_v29 = vmul.f32 2.0, %v1141_v47  ;;  %v1304_v51 = vmul.f32 2.0, %v1182_v11  ;;  %v1420_v47 = vmin.f32 %v1419_v23, %v3101_v42 }
 0x1aa   : > { %v3125_v8 = vsub.f32 %v1340_v28, %v1301_v61  ;;  %v3127_v4 = vsub.f32 %v1340_v28, %v1302_v19  ;;  %v1409_v54 = vmin.f32 %v1408_v40, %v3117_v52 }
 0x1ab   : > { %v3111_v45 = vsub.f32 %v1345_v13, %v1303_v29  ;;  %v3113_v26 = vsub.f32 %v1345_v13, %v1304_v51  ;;  %v1421_v11 = vmin.f32 %v1420_v47, %v3107_v16 }
 0x1ac   : > { %v1410_v47 = vmin.f32 %v1409_v54, %v3125_v8 }
 0x1ad   : > { %v1385_v55 = vmin.f32 %v1384_v49, %v3111_v45  ;;  %v1398_v60 = vmin.f32 %v1397_v56, %v3113_v26  ;;  %v1422_v25 = vmin.f32 %v1421_v11, %v3119_v43  ;;  %v3519_v56 = vlaneseq }
 0x1af   : > { %v1386_v24 = vrot.slane %v1385_v55, 4  ;;  %v1399_v29 = vrot.slane %v1398_v60, 4  ;;  %v1223_v23 = vpop.f32.mrf.mxu2  ;;  %v1264_v34 = vpop.f32.mrf.mxu3  ;;  %v1432_v38 = vshrl.u32 %v3519_v56, 7  ;;  %v1423_v61 = vmin.f32 %v1422_v25, %v3127_v4 }
 0x1b0   : > { %v1305_v51 = vmul.f32 2.0, %v1223_v23  ;;  %v1306_v49 = vmul.f32 2.0, %v1264_v34 }
 0x1b1   : > { %v1387_v59 = vmin.f32 %v1385_v55, %v1386_v24  ;;  %v1400_v37 = vmin.f32 %v1398_v60, %v1399_v29  ;;  %v1433_v34 = vadd.s32 8, %v1432_v38  ;;  %v1434_v60 = vadd.s32 16, %v1432_v38 }
 0x1b2   : > { %v3134_v28 = vsub.f32 %v1345_v13, %v1305_v51  ;;  %v3136_v19 = vsub.f32 %v1345_v13, %v1306_v49  ;;  %v3140_v25 = vcvt.s32.f32 %v1432_v38  ;;  %v1435_v13 = vadd.s32 24, %v1432_v38 }
 0x1b3   : > { %v1388_v53 = vrot.slane %v1387_v59, 2  ;;  %v1401_v32 = vrot.slane %v1400_v37, 2  ;;  %v3142_v51 = vcvt.s32.f32 %v1433_v34  ;;  %v1436_v49 = vadd.s32 32, %v1432_v38 }
 0x1b4   : > { %v1411_v40 = vmin.f32 %v1410_v47, %v3134_v28  ;;  %v1424_v11 = vmin.f32 %v1423_v61, %v3136_v19  ;;  %v1438_v34 = vadd.s32 48, %v1432_v38  ;;  %v3153_v46 = vcvt.s32.f32 %v1435_v13 }
 0x1b5   : > { %v1389_v23 = vmin.f32 %v1387_v59, %v1388_v53  ;;  %v1402_v55 = vmin.f32 %v1400_v37, %v1401_v32  ;;  %v3148_v53 = vcvt.s32.f32 %v1434_v60  ;;  %v1437_v37 = vadd.s32 40, %v1432_v38 }
 0x1b6   : > { %v1412_v29 = vrot.slane %v1411_v40, 4  ;;  %v1425_v54 = vrot.slane %v1424_v11, 4 }
 0x1b7   : > { %v1390_v24 = vrot.slane %v1389_v23, 1  ;;  %v1403_v36 = vrot.slane %v1402_v55, 1 }
 0x1b8   : > { %v1413_v32 = vmin.f32 %v1411_v40, %v1412_v29  ;;  %v1426_v59 = vmin.f32 %v1424_v11, %v1425_v54 }
 0x1b9   : > { %v1391_v12 = vmin.f32 %v1389_v23, %v1390_v24  ;;  %v3146_v47 = vmin.f32 %v1402_v55, %v1403_v36  ;;  %v1439_v24 = vadd.s32 56, %v1432_v38  ;;  %v3168_v55 = vcvt.s32.f32 %v1437_v37 }
 0x1ba   : > { %v1427_v40 = vrot.slane %v1426_v59, 2 }
 0x1bb   : > { %vm1448_vm4 = vcmp.le.f32.partialorder %v3043_v10, %v1391_v12  ;;  %vm1452_vm5 = vcmp.le.f32.partialorder %v3045_v44, %v1391_v12  ;;  %vm1456_vm6 = vcmp.le.f32.partialorder %v3053_v30, %v1391_v12  ;;  %v3155_v10 = vcvt.s32.f32 %v1436_v49 }
 0x1bc   : > { %v1480_v61 = vsel %vm1448_vm4, %v3140_v25, 64.0  ;;  %v1484_v23 = vsel %vm1452_vm5, %v3142_v51, 64.0  ;;  %vm1460_vm7 = vcmp.le.f32.partialorder %v3067_v6, %v1391_v12  ;;  %vm1449_vm8 = vcmp.le.f32.partialorder %v3047_v50, %v3146_v47 }
 0x1bd   : > { %v1512_v36 = vmin.f32 %v1480_v61, %v1484_v23  ;;  %vm1453_vm9 = vcmp.le.f32.partialorder %v3049_v21, %v3146_v47  ;;  %vm1464_vm10 = vcmp.le.f32.partialorder %v3077_v15, %v1391_v12  ;;  %v1488_v44 = vsel %vm1456_vm6, %v3148_v53, 64.0 }
 0x1be   : > { %v1414_v30 = vrot.slane %v1413_v32, 2  ;;  %vm1457_vm11 = vcmp.le.f32.partialorder %v3055_v62, %v3146_v47  ;;  %v1481_v11 = vsel %vm1449_vm8, %v3140_v25, 64.0  ;;  %v1485_v6 = vsel %vm1453_vm9, %v3142_v51, 64.0 }
 0x1bf   : > { %v1513_v38 = vmin.f32 %v1512_v36, %v1488_v44  ;;  %v3170_v50 = vcvt.s32.f32 %v1438_v34  ;;  %v3172_v60 = vcvt.s32.f32 %v1439_v24  ;;  %v1492_v21 = vsel %vm1460_vm7, %v3153_v46, 64.0 }
 0x1c0   : > { %vm1468_vm12 = vcmp.le.f32.partialorder %v3087_v33, %v1391_v12  ;;  %vm1461_vm13 = vcmp.le.f32.partialorder %v3069_v9, %v3146_v47  ;;  %v1525_v54 = vmin.f32 %v1481_v11, %v1485_v6  ;;  %v1496_v62 = vsel %vm1464_vm10, %v3155_v10, 64.0 }
 0x1c1   : > { %v1514_v29 = vmin.f32 %v1513_v38, %v1492_v21  ;;  %v1489_v13 = vsel %vm1457_vm11, %v3148_v53, 64.0  ;;  %v1415_v49 = vmin.f32 %v1413_v32, %v1414_v30  ;;  %v1428_v37 = vmin.f32 %v1426_v59, %v1427_v40 }
 0x1c2   : > { %vm1472_vm14 = vcmp.le.f32.partialorder %v3095_v57, %v1391_v12  ;;  %vm1465_vm15 = vcmp.le.f32.partialorder %v3079_v2, %v3146_v47  ;;  %v1526_v33 = vmin.f32 %v1525_v54, %v1489_v13  ;;  %vm1476_vm0 = vcmp.le.f32.partialorder %v3111_v45, %v1391_v12 }
 0x1c3   : > { %v1515_v61 = vmin.f32 %v1514_v29, %v1496_v62  ;;  %v1500_v9 = vsel %vm1468_vm12, %v3168_v55, 64.0  ;;  %v1493_v23 = vsel %vm1461_vm13, %v3153_v46, 64.0  ;;  %v1416_v34 = vrot.slane %v1415_v49, 1 }
 0x1c4   : > { %vm1469_vm1 = vcmp.le.f32.partialorder %v3089_v22, %v3146_v47  ;;  %v1527_v32 = vmin.f32 %v1526_v33, %v1493_v23  ;;  %v1429_v59 = vrot.slane %v1428_v37, 1  ;;  %v1504_v57 = vsel %vm1472_vm14, %v3170_v50, 64.0 }
 0x1c5   : > { %v1516_v15 = vmin.f32 %v1515_v61, %v1500_v9  ;;  %v1497_v24 = vsel %vm1465_vm15, %v3155_v10, 64.0  ;;  %v1417_v36 = vmin.f32 %v1415_v49, %v1416_v34  ;;  %vm1473_vm3 = vcmp.le.f32.partialorder %v3097_v31, %v3146_v47 }
 0x1c6   : > { %v1528_v12 = vmin.f32 %v1527_v32, %v1497_v24  ;;  %v1508_v45 = vsel %vm1476_vm0, %v3172_v60, 64.0  ;;  %v1501_v44 = vsel %vm1469_vm1, %v3168_v55, 64.0  ;;  %vm1477_vm6 = vcmp.le.f32.partialorder %v3113_v26, %v3146_v47 }
 0x1c7   : > { %v1517_v2 = vmin.f32 %v1516_v15, %v1504_v57  ;;  %vm1450_vm4 = vcmp.le.f32.partialorder %v3057_v17, %v1417_v36  ;;  %vm1454_vm5 = vcmp.le.f32.partialorder %v3063_v27, %v1417_v36  ;;  %v3200_v40 = vmin.f32 %v1428_v37, %v1429_v59 }
 0x1c8   : > { %v1529_v30 = vmin.f32 %v1528_v12, %v1501_v44  ;;  %v1505_v38 = vsel %vm1473_vm3, %v3170_v50, 64.0  ;;  %v1482_v31 = vsel %vm1450_vm4, %v3140_v25, 64.0  ;;  %v1486_v11 = vsel %vm1454_vm5, %v3142_v51, 64.0 }
 0x1c9   : > { %v1518_v22 = vmin.f32 %v1517_v2, %v1508_v45  ;;  %vm1458_vm7 = vcmp.le.f32.partialorder %v3073_v58, %v1417_v36  ;;  %v1509_v17 = vsel %vm1477_vm6, %v3172_v60, 64.0  ;;  %vm1462_vm8 = vcmp.le.f32.partialorder %v3099_v7, %v1417_v36 }
 0x1ca   : > { %v1530_v21 = vmin.f32 %v1529_v30, %v1505_v38  ;;  %v1538_v26 = vmin.f32 %v1482_v31, %v1486_v11  ;;  %vm1451_vm9 = vcmp.le.f32.partialorder %v3059_v18, %v3200_v40  ;;  %v1490_v47 = vsel %vm1458_vm7, %v3148_v53, 64.0 }
 0x1cb   : > { %v1519_v6 = vrot.slane %v1518_v22, 4  ;;  %vm1455_vm10 = vcmp.le.f32.partialorder %v3065_v41, %v3200_v40  ;;  %vm1466_vm11 = vcmp.le.f32.partialorder %v3105_v48, %v1417_v36  ;;  %vm1470_vm12 = vcmp.le.f32.partialorder %v3117_v52, %v1417_v36 }
 0x1cc   : > { %v1531_v29 = vmin.f32 %v1530_v21, %v1509_v17  ;;  %v1539_v58 = vmin.f32 %v1538_v26, %v1490_v47  ;;  %v1494_v7 = vsel %vm1462_vm8, %v3153_v46, 64.0  ;;  %vm1459_vm13 = vcmp.le.f32.partialorder %v3075_v1, %v3200_v40 }
 0x1cd   : > { %v1520_v27 = vmin.f32 %v1518_v22, %v1519_v6  ;;  %v1483_v13 = vsel %vm1451_vm9, %v3140_v25, 64.0  ;;  %v1487_v61 = vsel %vm1455_vm10, %v3142_v51, 64.0  ;;  %vm1474_vm14 = vcmp.le.f32.partialorder %v3125_v8, %v1417_v36 }
 0x1ce   : > { %v1532_v62 = vrot.slane %v1531_v29, 4  ;;  %v1540_v37 = vmin.f32 %v1539_v58, %v1494_v7  ;;  %v1498_v41 = vsel %vm1466_vm11, %v3155_v10, 64.0  ;;  %vm1478_vm15 = vcmp.le.f32.partialorder %v3134_v28, %v1417_v36 }
 0x1cf   : > { %v1521_v54 = vrot.slane %v1520_v27, 2  ;;  %v1502_v9 = vsel %vm1470_vm12, %v3168_v55, 64.0  ;;  %vm1463_vm0 = vcmp.le.f32.partialorder %v3101_v42, %v3200_v40  ;;  %v1491_v1 = vsel %vm1459_vm13, %v3148_v53, 64.0 }
 0x1d0   : > { %v1533_v49 = vmin.f32 %v1531_v29, %v1532_v62  ;;  %v1541_v52 = vmin.f32 %v1540_v37, %v1498_v41  ;;  %v1551_v23 = vmin.f32 %v1483_v13, %v1487_v61  ;;  %v1506_v8 = vsel %vm1474_vm14, %v3170_v50, 64.0  ;;  %v3287_v29 = vld [vmem:[%s3472_s5] sm:$0xff]  ;;  %v1661_v41 = vld [vmem:[%s3472_s5 + $0x8] sm:$0xff] }
 0x1d1   : > { %v1522_v18 = vmin.f32 %v1520_v27, %v1521_v54  ;;  %vm1467_vm1 = vcmp.le.f32.partialorder %v3107_v16, %v3200_v40  ;;  %v1495_v2 = vsel %vm1463_vm0, %v3153_v46, 64.0  ;;  %v1510_v42 = vsel %vm1478_vm15, %v3172_v60, 64.0 }
 0x1d2   : > { %v1534_v33 = vrot.slane %v1533_v49, 2  ;;  %v1542_v32 = vmin.f32 %v1541_v52, %v1502_v9  ;;  %v1552_v59 = vmin.f32 %v1551_v23, %v1491_v1  ;;  %vm1471_vm4 = vcmp.le.f32.partialorder %v3119_v43, %v3200_v40 }
 0x1d3   : > { %v1523_v48 = vrot.slane %v1522_v18, 1  ;;  %v2400_v45 = vmov 1.0   ;;  %v1499_v22 = vsel %vm1467_vm1, %v3155_v10, 64.0  ;;  %vm1475_vm6 = vcmp.le.f32.partialorder %v3127_v4, %v3200_v40 }
 0x1d4   : > { %v1535_v15 = vmin.f32 %v1533_v49, %v1534_v33  ;;  %v1543_v24 = vmin.f32 %v1542_v32, %v1506_v8  ;;  %v1553_v12 = vmin.f32 %v1552_v59, %v1495_v2  ;;  %v1503_v43 = vsel %vm1471_vm4, %v3168_v55, 64.0 }
 0x1d5   : > { %v3227_v34 = vmin.f32 %v1522_v18, %v1523_v48  ;;  %vm1479_vm9 = vcmp.le.f32.partialorder %v3136_v19, %v3200_v40  ;;  %v1507_v38 = vsel %vm1475_vm6, %v3170_v50, 64.0 }
 0x1d6   : > { %v1536_v57 = vrot.slane %v1535_v15, 1  ;;  %v1544_v44 = vmin.f32 %v1543_v24, %v1510_v42  ;;  %v1554_v28 = vmin.f32 %v1553_v12, %v1499_v22  ;;  %v1511_v40 = vsel %vm1479_vm9, %v3172_v60, 64.0 }
 0x1d7   : > { %vm1592_vm3 = vcmp.eq.f32.partialorder %v3172_v60, %v3227_v34  ;;  %vm1588_vm5 = vcmp.eq.f32.partialorder %v3170_v50, %v3227_v34  ;;  %vm1584_vm8 = vcmp.eq.f32.partialorder %v3168_v55, %v3227_v34  ;;  %vm1580_vm11 = vcmp.eq.f32.partialorder %v3155_v10, %v3227_v34 }
 0x1d8   : > { %2235 = vmatpush.msk.msrb.mxu0 %vm1592_vm3, %v2400_v45  ;;  %v3241_v16 = vmin.f32 %v1535_v15, %v1536_v57  ;;  %v1545_v36 = vrot.slane %v1544_v44, 4  ;;  %v1555_v30 = vmin.f32 %v1554_v28, %v1503_v43  ;;  %vm1576_vm13 = vcmp.eq.f32.partialorder %v3153_v46, %v3227_v34 }
 0x1d9   : > { %vm1572_vm15 = vcmp.eq.f32.partialorder %v3148_v53, %v3227_v34  ;;  %vm1568_vm1 = vcmp.eq.f32.partialorder %v3142_v51, %v3227_v34  ;;  %vm1664_vm3 = vcmask 523264   ;;  %v2288_v48 = vceil.f32 %v3227_v34 }
 0x1da   : > { %2236 = vmatpush.msk.msrb.mxu0 %vm1588_vm5, %v2400_v45  ;;  %vm1593_vm7 = vcmp.eq.f32.partialorder %v3172_v60, %v3241_v16  ;;  %v1546_v4 = vmin.f32 %v1544_v44, %v1545_v36  ;;  %vm1589_vm10 = vcmp.eq.f32.partialorder %v3170_v50, %v3241_v16  ;;  %v1556_v31 = vmin.f32 %v1555_v30, %v1507_v38 }
 0x1db   : > { %2247 = vmatpush.msk.msrb.mxu1 %vm1593_vm7, %v2400_v45  ;;  %vm1585_vm12 = vcmp.eq.f32.partialorder %v3168_v55, %v3241_v16  ;;  %vm1581_vm14 = vcmp.eq.f32.partialorder %v3155_v10, %v3241_v16  ;;  %vm1577_vm0 = vcmp.eq.f32.partialorder %v3153_v46, %v3241_v16  ;;  %vm1573_vm4 = vcmp.eq.f32.partialorder %v3148_v53, %v3241_v16 }
 0x1dc   : > { %2237 = vmatpush.msk.msrb.mxu0 %vm1584_vm8, %v2400_v45  ;;  %v1547_v19 = vrot.slane %v1546_v4, 2  ;;  %v1557_v11 = vmin.f32 %v1556_v31, %v1511_v40  ;;  %vm1564_vm5 = vcmp.eq.f32.partialorder %v3140_v25, %v3227_v34  ;;  %vm1569_vm7 = vcmp.eq.f32.partialorder %v3142_v51, %v3241_v16 }
 0x1dd   : > { %2248 = vmatpush.msk.msrb.mxu1 %vm1589_vm10, %v2400_v45  ;;  %vm1565_vm8 = vcmp.eq.f32.partialorder %v3140_v25, %v3241_v16  ;;  %vm2292_vm9 = vcmp.lt.s32.totalorder %v3241_v16, 0  ;;  %v2293_v62 = vceil.f32 %v3241_v16  ;;  %v2294_v58 = vfloor.f32 %v3241_v16 }
 0x1de   : > { %2238 = vmatpush.msk.msrb.mxu0 %vm1580_vm11, %v2400_v45  ;;  %v1548_v6 = vmin.f32 %v1546_v4, %v1547_v19  ;;  %v1558_v21 = vrot.slane %v1557_v11, 4  ;;  %v2289_v33 = vfloor.f32 %v3227_v34  ;;  %v1826_v4 = vmin.f32 %v2548_v0, 1.0 }
 0x1df   : > { %2249 = vmatpush.msk.msrb.mxu1 %vm1585_vm12, %v2400_v45  ;;  %v2295_v37 = vsel %vm2292_vm9, %v2293_v62, %v2294_v58  ;;  %vm1817_vm9 = vcmask 1042434   ;;  %v1827_v38 = vmin.f32 %v2553_v3, 1.0  ;;  %v1828_v40 = vmin.f32 %v2557_v5, 1.0  ;;  %v3525_v58 = vld [vmem:[#allocation9_spill] sm:$0xff] }
 0x1e0   : > { %2239 = vmatpush.msk.msrb.mxu0 %vm1576_vm13, %v2400_v45  ;;  %v1549_v17 = vrot.slane %v1548_v6, 1  ;;  %v1559_v27 = vmin.f32 %v1557_v11, %v1558_v21  ;;  %v2296_v52 = vcvt.f32.s32 %v2295_v37  ;;  %v3522_v11 = vld [vmem:[#allocation2_spill] sm:$0xff]  ;;  %v3526_v37 = vld [vmem:[#allocation3_spill] sm:$0xff] }
 0x1e1   : > { %2250 = vmatpush.msk.msrb.mxu1 %vm1581_vm14, %v2400_v45  ;;  %v1834_v21 = vrot.slane %v1827_v38, 7 }
 0x1e2   : > { %2240 = vmatpush.msk.msrb.mxu0 %vm1572_vm15, %v2400_v45  ;;  %v3289_v26 = vmin.f32 %v1548_v6, %v1549_v17  ;;  %v1560_v47 = vrot.slane %v1559_v27, 2  ;;  %v1813_v15 = vrot.slane %v2296_v52, 7 }
 0x1e3   : > { %2251 = vmatpush.msk.msrb.mxu1 %vm1577_vm0, %v2400_v45  ;;  %vm2287_vm0 = vcmp.lt.s32.totalorder %v3227_v34, 0  ;;  %v1837_v3 = vsel %vm526_vm2, %v1826_v4, %v1834_v21 }
 0x1e4   : > { %2241 = vmatpush.msk.msrb.mxu0 %vm1568_vm1, %v2400_v45  ;;  %vm1594_vm6 = vcmp.eq.f32.partialorder %v3172_v60, %v3289_v26  ;;  %v1561_v54 = vmin.f32 %v1559_v27, %v1560_v47  ;;  %vm1590_vm10 = vcmp.eq.f32.partialorder %v3170_v50, %v3289_v26  ;;  %vm2297_vm11 = vcmp.lt.s32.totalorder %v3289_v26, 0 }
 0x1e5   : > { %2252 = vmatpush.msk.msrb.mxu1 %vm1573_vm4, %v2400_v45  ;;  %2259 = vmatpush.msk.msrb.mxu2 %vm1594_vm6, %v2400_v45  ;;  %v2298_v7 = vceil.f32 %v3289_v26  ;;  %v2299_v13 = vfloor.f32 %v3289_v26  ;;  %vm1586_vm12 = vcmp.eq.f32.partialorder %v3168_v55, %v3289_v26  ;;  %vm1582_vm13 = vcmp.eq.f32.partialorder %v3155_v10, %v3289_v26 }
 0x1e6   : > { %2242 = vmatpush.msk.msrb.mxu0 %vm1564_vm5, %v2400_v45  ;;  %v1562_v18 = vrot.slane %v1561_v54, 1  ;;  %vm1578_vm15 = vcmp.eq.f32.partialorder %v3153_v46, %v3289_v26  ;;  %vm1574_vm5 = vcmp.eq.f32.partialorder %v3148_v53, %v3289_v26  ;;  %v2290_v23 = vsel %vm2287_vm0, %v2288_v48, %v2289_v33  ;;  %v3528_v33 = vld [vmem:[#allocation7_spill] sm:$0xff] }
 0x1e7   : > { %2243 = vmatmul.msk.f32.vlgmr.msrb.gmra.mxu0 %vm1664_vm3, %v3287_v29  ;;  %2253 = vmatpush.msk.msrb.mxu1 %vm1569_vm7, %v2400_v45  ;;  %v2300_v61 = vsel %vm2297_vm11, %v2298_v7, %v2299_v13  ;;  %vm1570_vm7 = vcmp.eq.f32.partialorder %v3142_v51, %v3289_v26  ;;  %v2291_v8 = vcvt.f32.s32 %v2290_v23  ;;  %vm1819_vm11 = vcmask 1041408  }
 0x1e8   : > { %2260 = vmatpush.msk.msrb.mxu2 %vm1590_vm10, %v2400_v45  ;;  %v1563_v49 = vmin.f32 %v1561_v54, %v1562_v18  ;;  %v2301_v9 = vcvt.f32.s32 %v2300_v61  ;;  %vm1566_vm10 = vcmp.eq.f32.partialorder %v3140_v25, %v3289_v26  ;;  %v1835_v27 = vrot.slane %v1828_v40, 6 }
 0x1e9   : > { %2254 = vmatpush.msk.msrb.mxu1 %vm1565_vm8, %v2400_v45  ;;  %v1816_v57 = vsel %vm526_vm2, %v2291_v8, %v1813_v15 }
 0x1ea   : > { %2255 = vmatmul.msk.f32.vlgmr.msrb.gmra.mxu1 %vm1664_vm3, %v3287_v29  ;;  %2261 = vmatpush.msk.msrb.mxu2 %vm1586_vm12, %v2400_v45  ;;  %vm1595_vm14 = vcmp.eq.f32.partialorder %v3172_v60, %v1563_v49  ;;  %vm1591_vm1 = vcmp.eq.f32.partialorder %v3170_v50, %v1563_v49  ;;  %vm2302_vm4 = vcmp.lt.s32.totalorder %v1563_v49, 0  ;;  %v2303_v60 = vceil.f32 %v1563_v49 }
 0x1eb   : > { %2271 = vmatpush.msk.msrb.mxu3 %vm1595_vm14, %v2400_v45  ;;  %v2304_v1 = vfloor.f32 %v1563_v49  ;;  %vm1587_vm6 = vcmp.eq.f32.partialorder %v3168_v55, %v1563_v49  ;;  %v1814_v32 = vrot.slane %v2301_v9, 6  ;;  %vm1583_vm8 = vcmp.eq.f32.partialorder %v3155_v10, %v1563_v49  ;;  %v1662_v55 = vld [vmem:[%s3472_s5 + $0x10] sm:$0xff] }
 0x1ec   : > { %2262 = vmatpush.msk.msrb.mxu2 %vm1582_vm13, %v2400_v45  ;;  %vm1579_vm12 = vcmp.eq.f32.partialorder %v3153_v46, %v1563_v49  ;;  %vm3365_vm13 = vcmp.lt.s32.totalorder %v3519_v56, 512  ;;  %vm1575_vm14 = vcmp.eq.f32.partialorder %v3148_v53, %v1563_v49  ;;  %vm1567_vm0 = vcmp.eq.f32.partialorder %v3140_v25, %v1563_v49  ;;  %v1663_v56 = vld [vmem:[%s3472_s5 + $0x18] sm:$0xff] }
 0x1ed   : > { %2272 = vmatpush.msk.msrb.mxu3 %vm1591_vm1, %v2400_v45  ;;  %v2305_v34 = vsel %vm2302_vm4, %v2303_v60, %v2304_v1 }
 0x1ee   : > { %2263 = vmatpush.msk.msrb.mxu2 %vm1578_vm15, %v2400_v45  ;;  %v2306_v50 = vcvt.f32.s32 %v2305_v34  ;;  %vm1571_vm15 = vcmp.eq.f32.partialorder %v3142_v51, %v1563_v49 }
 0x1ef   : > { %2244 = vmatmul.msk.f32.gmra.mxu0 %vm1664_vm3, %v1661_v41  ;;  %2273 = vmatpush.msk.msrb.mxu3 %vm1587_vm6, %v2400_v45 }
 0x1f0   : > { %2264 = vmatpush.msk.msrb.mxu2 %vm1574_vm5, %v2400_v45  ;;  %v1815_v59 = vrot.slane %v2306_v50, 5 }
 0x1f1   : > { %2274 = vmatpush.msk.msrb.mxu3 %vm1583_vm8, %v2400_v45 }
 0x1f2   : > { %2256 = vmatmul.msk.f32.gmra.mxu1 %vm1664_vm3, %v1661_v41  ;;  %2265 = vmatpush.msk.msrb.mxu2 %vm1570_vm7, %v2400_v45  ;;  %v1818_v46 = vsel %vm1817_vm9, %v1814_v32, %v1815_v59  ;;  %v3529_v59 = vld [vmem:[#allocation11_spill] sm:$0xff] }
 0x1f3   : > { %2275 = vmatpush.msk.msrb.mxu3 %vm1579_vm12, %v2400_v45  ;;  %v1820_v24 = vsel %vm1819_vm11, %v1816_v57, %v1818_v46 }
 0x1f4   : > { %2266 = vmatpush.msk.msrb.mxu2 %vm1566_vm10, %v2400_v45  ;;  %1825 = vst.msk [vmem:[%s476_s18] sm:$0xf] %vm3365_vm13, %v1820_v24 }
 0x1f5   : > { %2267 = vmatmul.msk.f32.vlgmr.msrb.gmra.mxu2 %vm1664_vm3, %v3287_v29  ;;  %2276 = vmatpush.msk.msrb.mxu3 %vm1575_vm14, %v2400_v45 }
 0x1f7   : > { %2245 = vmatmul.msk.f32.gmra.mxu0 %vm1664_vm3, %v1662_v55  ;;  %2277 = vmatpush.msk.msrb.mxu3 %vm1571_vm15, %v2400_v45 }
 0x1f9   : > { %2278 = vmatpush.msk.msrb.mxu3 %vm1567_vm0, %v2400_v45 }
 0x1fa   : > { %2257 = vmatmul.msk.f32.gmra.mxu1 %vm1664_vm3, %v1662_v55  ;;  %2279 = vmatmul.msk.f32.vlgmr.msrb.gmra.mxu3 %vm1664_vm3, %v3287_v29  ;;  %v3523_v29 = vld [vmem:[#allocation10_spill] sm:$0xff] }
 0x1fd   : > { %2268 = vmatmul.msk.f32.gmra.mxu2 %vm1664_vm3, %v1661_v41 }
 0x1ff   : > { %2246 = vmatmul.msk.f32.gmra.mxu0 %vm1664_vm3, %v1663_v56 }
 0x202   : > { %2258 = vmatmul.msk.f32.gmra.mxu1 %vm1664_vm3, %v1663_v56  ;;  %2280 = vmatmul.msk.f32.gmra.mxu3 %vm1664_vm3, %v1661_v41  ;;  %v3527_v41 = vld [vmem:[#allocation12_spill] sm:$0xff] }
 0x205   : > { %2269 = vmatmul.msk.f32.gmra.mxu2 %vm1664_vm3, %v1662_v55 }
 0x20a   : > { %2281 = vmatmul.msk.f32.gmra.mxu3 %vm1664_vm3, %v1662_v55 }
 0x20d   : > { %2270 = vmatmul.msk.f32.gmra.mxu2 %vm1664_vm3, %v1663_v56 }
 0x212   : > { %2282 = vmatmul.msk.f32.gmra.mxu3 %vm1664_vm3, %v1663_v56 }
 0x264   : > { %v1694_v25 = vpop.f32.mrf.mxu0 }
 0x265   : > { %1793 = vst [vmem:[%s3402_s24] sm:$0xff] %v1694_v25  ;;  %v1842_v0 = vsub.f32 %v1694_v25, %v3523_v29  ;;  %v3530_v25 = vld [vmem:[#allocation4_spill] sm:$0xff] }
 0x267   : > { %v1723_v51 = vpop.f32.mrf.mxu1  ;;  %v1858_v9 = vmul.f32 %v1842_v0, %v1842_v0 }
 0x268   : > { %1794 = vst [vmem:[%s3402_s24 + $0x8] sm:$0xff] %v1723_v51  ;;  %v1843_v43 = vsub.f32 %v1723_v51, %v2949_v39 }
 0x26a   : > { %v1859_v6 = vmul.f32 %v1843_v43, %v1843_v43 }
 0x26c   : > { %v1697_v53 = vpop.f32.mrf.mxu0 }
 0x26d   : > { %1797 = vst [vmem:[%s3402_s24 + $0x20] sm:$0xff] %v1697_v53  ;;  %v1846_v39 = vsub.f32 %v1697_v53, %v2925_v63  ;;  %v3531_v53 = vld [vmem:[#allocation13_spill] sm:$0xff] }
 0x26f   : > { %v1726_v2 = vpop.f32.mrf.mxu1  ;;  %v1862_v18 = vmul.f32 %v1846_v39, %v1846_v39 }
 0x270   : > { %1798 = vst [vmem:[%s3402_s24 + $0x28] sm:$0xff] %v1726_v2  ;;  %v1847_v28 = vsub.f32 %v1726_v2, %v2933_v35  ;;  %v1829_v35 = vmin.f32 %v3522_v11, 1.0 }
 0x271   : > { %v1874_v34 = vadd.f32 %v1862_v18, %v1858_v9 }
 0x272   : > { %v1863_v31 = vmul.f32 %v1847_v28, %v1847_v28 }
 0x274   : > { %v1700_v42 = vpop.f32.mrf.mxu0  ;;  %v1883_v5 = vadd.f32 %v1863_v31, %v1859_v6 }
 0x275   : > { %1801 = vst [vmem:[%s3402_s24 + $0x40] sm:$0xff] %v1700_v42 }
 0x277   : > { %v1729_v12 = vpop.f32.mrf.mxu1 }
 0x278   : > { %1802 = vst [vmem:[%s3402_s24 + $0x48] sm:$0xff] %v1729_v12  ;;  %v1752_v45 = vpop.f32.mrf.mxu2  ;;  %v1851_v30 = vsub.f32 %v1729_v12, %v2917_v20  ;;  %v1836_v20 = vrot.slane %v1829_v35, 5  ;;  %v3532_v12 = vld [vmem:[#allocation8_spill] sm:$0xff]  ;;  %v3533_v35 = vld [vmem:[#allocation6_spill] sm:$0xff] }
 0x279   : > { %1795 = vst [vmem:[%s3402_s24 + $0x10] sm:$0xff] %v1752_v45  ;;  %v1844_v48 = vsub.f32 %v1752_v45, %v3527_v41 }
 0x27a   : > { %v1867_v17 = vmul.f32 %v1851_v30, %v1851_v30  ;;  %v1838_v63 = vsel %vm1817_vm9, %v1835_v27, %v1836_v20 }
 0x27b   : > { %v1839_v13 = vsel %vm1819_vm11, %v1837_v3, %v1838_v63  ;;  %v1860_v15 = vmul.f32 %v1844_v48, %v1844_v48 }
 0x27c   : > { %v1703_v16 = vpop.f32.mrf.mxu0  ;;  %v1884_v49 = vadd.f32 %v1883_v5, %v1867_v17  ;;  %1841 = vst.msk [vmem:[%s485_s26] sm:$0xf] %vm3365_vm13, %v1839_v13 }
 0x27d   : > { %1805 = vst [vmem:[%s3402_s24 + $0x60] sm:$0xff] %v1703_v16  ;;  %v1781_v22 = vpop.f32.mrf.mxu3  ;;  %v1854_v61 = vsub.f32 %v1703_v16, %v3526_v37 }
 0x27e   : > { %1796 = vst [vmem:[%s3402_s24 + $0x18] sm:$0xff] %v1781_v22  ;;  %v1845_v2 = vsub.f32 %v1781_v22, %v3531_v53 }
 0x27f   : > { %v1732_v44 = vpop.f32.mrf.mxu1  ;;  %v1870_v50 = vmul.f32 %v1854_v61, %v1854_v61 }
 0x280   : > { %1806 = vst [vmem:[%s3402_s24 + $0x68] sm:$0xff] %v1732_v44  ;;  %v1755_v36 = vpop.f32.mrf.mxu2  ;;  %v1855_v19 = vsub.f32 %v1732_v44, %v2903_v14  ;;  %v3524_v14 = vld [vmem:[#allocation5_spill] sm:$0xff]  ;;  %v1861_v30 = vmul.f32 %v1845_v2, %v1845_v2 }
 0x281   : > { %1799 = vst [vmem:[%s3402_s24 + $0x30] sm:$0xff] %v1755_v36  ;;  %v1850_v47 = vsub.f32 %v1700_v42, %v3524_v14  ;;  %v1848_v7 = vsub.f32 %v1755_v36, %v3525_v58 }
 0x282   : > { %v1871_v54 = vmul.f32 %v1855_v19, %v1855_v19 }
 0x283   : > { %v1866_v60 = vmul.f32 %v1850_v47, %v1850_v47  ;;  %v1864_v23 = vmul.f32 %v1848_v7, %v1848_v7 }
 0x284   : > { %v1885_v1 = vadd.f32 %v1884_v49, %v1871_v54 }
 0x285   : > { %v1784_v26 = vpop.f32.mrf.mxu3  ;;  %v1875_v8 = vadd.f32 %v1874_v34, %v1866_v60  ;;  %v1892_v56 = vadd.f32 %v1864_v23, %v1860_v15 }
 0x286   : > { %1800 = vst [vmem:[%s3402_s24 + $0x38] sm:$0xff] %v1784_v26  ;;  %v1849_v57 = vsub.f32 %v1784_v26, %v3529_v59  ;;  %v1886_v46 = vrot.slane %v1885_v1, 4 }
 0x287   : > { %v1876_v42 = vadd.f32 %v1875_v8, %v1870_v50 }
 0x288   : > { %v1758_v62 = vpop.f32.mrf.mxu2  ;;  %v1865_v28 = vmul.f32 %v1849_v57, %v1849_v57  ;;  %v1887_v36 = vadd.f32 %v1886_v46, %v1885_v1 }
 0x289   : > { %1803 = vst [vmem:[%s3402_s24 + $0x50] sm:$0xff] %v1758_v62  ;;  %v1852_v52 = vsub.f32 %v1758_v62, %v3528_v33  ;;  %v1877_v4 = vrot.slane %v1876_v42, 4 }
 0x28a   : > { %v1901_v40 = vadd.f32 %v1865_v28, %v1861_v30  ;;  %v1888_v11 = vrot.slane %v1887_v36, 2 }
 0x28b   : > { %v1868_v32 = vmul.f32 %v1852_v52, %v1852_v52  ;;  %v1878_v22 = vadd.f32 %v1877_v4, %v1876_v42 }
 0x28c   : > { %v1889_v20 = vadd.f32 %v1888_v11, %v1887_v36 }
 0x28d   : > { %v1787_v55 = vpop.f32.mrf.mxu3  ;;  %v1893_v16 = vadd.f32 %v1892_v56, %v1868_v32  ;;  %v1879_v26 = vrot.slane %v1878_v22, 2 }
 0x28e   : > { %1804 = vst [vmem:[%s3402_s24 + $0x58] sm:$0xff] %v1787_v55  ;;  %v1853_v45 = vsub.f32 %v1787_v55, %v3532_v12  ;;  %v1890_v5 = vrot.slane %v1889_v20, 1 }
 0x28f   : > { %v1880_v54 = vadd.f32 %v1879_v26, %v1878_v22 }
 0x290   : > { %v1761_v24 = vpop.f32.mrf.mxu2  ;;  %v1869_v38 = vmul.f32 %v1853_v45, %v1853_v45  ;;  %v1891_v63 = vadd.f32 %v1890_v5, %v1889_v20 }
 0x291   : > { %1807 = vst [vmem:[%s3402_s24 + $0x70] sm:$0xff] %v1761_v24  ;;  %v1856_v51 = vsub.f32 %v1761_v24, %v3530_v25  ;;  %v1881_v13 = vrot.slane %v1880_v54, 1 }
 0x292   : > { %v1902_v39 = vadd.f32 %v1901_v40, %v1869_v38  ;;  %v1914_v49 = vrot.slane %v1891_v63, 7 }
 0x293   : > { %v1872_v44 = vmul.f32 %v1856_v51, %v1856_v51  ;;  %v1882_v41 = vadd.f32 %v1881_v13, %v1880_v54 }
 0x295   : > { %v1894_v43 = vadd.f32 %v1893_v16, %v1872_v44  ;;  %v1790_v19 = vpop.f32.mrf.mxu3  ;;  %v1917_v33 = vsel %vm526_vm2, %v1882_v41, %v1914_v49 }
 0x296   : > { %1808 = vst [vmem:[%s3402_s24 + $0x78] sm:$0xff] %v1790_v19  ;;  %v1857_v6 = vsub.f32 %v1790_v19, %v3533_v35 }
 0x297   : > { %v1895_v31 = vrot.slane %v1894_v43, 4 }
 0x298   : > { %v1873_v17 = vmul.f32 %v1857_v6, %v1857_v6 }
 0x299   : > { %v1896_v21 = vadd.f32 %v1895_v31, %v1894_v43 }
 0x29a   : > { %v1903_v29 = vadd.f32 %v1902_v39, %v1873_v17 }
 0x29b   : > { %v1897_v27 = vrot.slane %v1896_v21, 2 }
 0x29c   : > { %v1904_v3 = vrot.slane %v1903_v29, 4 }
 0x29d   : > { %v1898_v0 = vadd.f32 %v1897_v27, %v1896_v21 }
 0x29e   : > { %v1905_v47 = vadd.f32 %v1904_v3, %v1903_v29 }
 0x29f   : > { %v1899_v14 = vrot.slane %v1898_v0, 1 }
 0x2a0   : > { %v1906_v62 = vrot.slane %v1905_v47, 2 }
 0x2a1   : > { %v1900_v58 = vadd.f32 %v1899_v14, %v1898_v0 }
 0x2a2   : > { %v1907_v7 = vadd.f32 %v1906_v62, %v1905_v47 }
 0x2a3   : > { %v1915_v37 = vrot.slane %v1900_v58, 6 }
 0x2a4   : > { %v1908_v18 = vrot.slane %v1907_v7, 1 }
 0x2a6   : > { %v1909_v61 = vadd.f32 %v1908_v18, %v1907_v7 }
 0x2a8   : > { %v1916_v48 = vrot.slane %v1909_v61, 5 }
 0x2aa   : > { %v1918_v52 = vsel %vm1817_vm9, %v1915_v37, %v1916_v48 }
 0x2ab   : > { %v1919_v9 = vsel %vm1819_vm11, %v1917_v33, %v1918_v52 }
 0x2ac   : > { %1921 = vst.msk [vmem:[%s494_s30] sm:$0xf] %vm3365_vm13, %v1919_v9 }
 0x2ad PF: > { %s21_s15 = sadd.s32 1, %s2393_s15   ;;  %s3534_s13 = smov %s2389_s14 }
 0x2ae   : > { %p18_p5 = scmp.ge.s32.totalorder %s21_s15, 4   ;;  %s3535_s14 = smov %s3537_s16 }
 0x2b0   :  { %20 = sbr.rel (!%p18_p5) target bundleno = 2 (0x2), region = 120 }

</bundles_post_ra>
